<compile_context>
chip_gen: v7x
topology: tpu7x:2x2x1
jax: 0.10.0
libtpu: 0.0.40
codegen_flags: <defaults>
</compile_context>

<pallas_src>
import functools
import math

import jax
import jax.numpy as jnp
from jax.experimental import pallas as pl
from jax.experimental.pallas import tpu as pltpu


_VMEM_LIMIT = 32 * 1024 * 1024  # explicit scoped-VMEM budget, safe on v5e/v6e/v7x


# ------------------------- fused tiled linear kernel -------------------------
# y = x @ w + b  [-> GELU] [-> + residual] [-> LayerNorm]     (f32 accumulation)

def _fused_linear_kernel(*refs, activation, has_residual, has_ln, ln_eps):
    idx = 0
    x_ref = refs[idx]; idx += 1
    w_ref = refs[idx]; idx += 1
    b_ref = refs[idx]; idx += 1
    res_ref = None
    if has_residual:
        res_ref = refs[idx]; idx += 1
    g_ref = beta_ref = None
    if has_ln:
        g_ref = refs[idx]; idx += 1
        beta_ref = refs[idx]; idx += 1
    o_ref = refs[idx]; idx += 1
    acc_ref = refs[idx]

    k = pl.program_id(2)

    @pl.when(k == 0)
    def _():
        acc_ref[...] = jnp.zeros_like(acc_ref)

    acc_ref[...] += jnp.dot(x_ref[...], w_ref[...],
                            preferred_element_type=jnp.float32)

    @pl.when(k == pl.num_programs(2) - 1)
    def _():
        y = acc_ref[...] + b_ref[...].astype(jnp.float32)
        if activation == "gelu":
            # exact (erf) GELU on the f32 accumulator, matches torch.nn.GELU()
            y = 0.5 * y * (1.0 + jax.lax.erf(y * (1.0 / math.sqrt(2.0))))
        if has_residual:
            y = y + res_ref[...].astype(jnp.float32)
        if has_ln:
            mu = jnp.mean(y, axis=-1, keepdims=True)
            var = jnp.mean((y - mu) * (y - mu), axis=-1, keepdims=True)
            y = (y - mu) * jax.lax.rsqrt(var + ln_eps)
            y = y * g_ref[...].astype(jnp.float32) + beta_ref[...].astype(jnp.float32)
        o_ref[...] = y.astype(o_ref.dtype)


def pallas_fused_linear(x, w, b, residual=None, gamma=None, beta=None,
                        activation=None, ln_eps=1e-12,
                        tm=256, tn=512, tk=512, out_dtype=jnp.bfloat16):
    """x: (M, K) bf16, w: (K, N) bf16, b: (N,) f32 -> (M, N) bf16."""
    M, K = x.shape
    N = w.shape[1]
    has_res = residual is not None
    has_ln = gamma is not None
    if has_ln:
        tn = N  # LayerNorm needs the full feature row in one block
    tm = min(tm, M)
    tn = min(tn, N)
    tk = min(tk, K)
    assert M % tm == 0 and N % tn == 0 and K % tk == 0

    in_specs = [
        pl.BlockSpec((tm, tk), lambda i, j, k: (i, k)),
        pl.BlockSpec((tk, tn), lambda i, j, k: (k, j)),
        pl.BlockSpec((1, tn), lambda i, j, k: (0, j)),
    ]
    inputs = [x, w, b.reshape(1, N)]
    if has_res:
        in_specs.append(pl.BlockSpec((tm, tn), lambda i, j, k: (i, j)))
        inputs.append(residual)
    if has_ln:
        in_specs.append(pl.BlockSpec((1, tn), lambda i, j, k: (0, j)))
        in_specs.append(pl.BlockSpec((1, tn), lambda i, j, k: (0, j)))
        inputs.append(gamma.reshape(1, N))
        inputs.append(beta.reshape(1, N))

    kernel = functools.partial(_fused_linear_kernel, activation=activation,
                               has_residual=has_res, has_ln=has_ln, ln_eps=ln_eps)
    return pl.pallas_call(
        kernel,
        out_shape=jax.ShapeDtypeStruct((M, N), out_dtype),
        grid=(M // tm, N // tn, K // tk),
        in_specs=in_specs,
        out_specs=pl.BlockSpec((tm, tn), lambda i, j, k: (i, j)),
        scratch_shapes=[pltpu.VMEM((tm, tn), jnp.float32)],
        compiler_params=pltpu.CompilerParams(
            dimension_semantics=("parallel", "parallel", "arbitrary"),
            vmem_limit_bytes=_VMEM_LIMIT),
    )(*inputs)


# ------------------------------ LayerNorm (embeddings) ------------------------------

def _layernorm_kernel(x_ref, g_ref, b_ref, o_ref, *, eps):
    x = x_ref[...].astype(jnp.float32)
    mu = jnp.mean(x, axis=-1, keepdims=True)
    var = jnp.mean((x - mu) * (x - mu), axis=-1, keepdims=True)
    y = (x - mu) * jax.lax.rsqrt(var + eps)
    o_ref[...] = (y * g_ref[...] + b_ref[...]).astype(o_ref.dtype)


def pallas_layernorm(x, gamma, beta, eps, out_dtype=jnp.bfloat16, tm=256):
    M, N = x.shape
    tm = min(tm, M)
    assert M % tm == 0
    return pl.pallas_call(
        functools.partial(_layernorm_kernel, eps=eps),
        out_shape=jax.ShapeDtypeStruct((M, N), out_dtype),
        grid=(M // tm,),
        in_specs=[
            pl.BlockSpec((tm, N), lambda i: (i, 0)),
            pl.BlockSpec((1, N), lambda i: (0, 0)),
            pl.BlockSpec((1, N), lambda i: (0, 0)),
        ],
        out_specs=pl.BlockSpec((tm, N), lambda i: (i, 0)),
        compiler_params=pltpu.CompilerParams(dimension_semantics=("parallel",)),
    )(x, gamma.reshape(1, N), beta.reshape(1, N))


# ------------------------------ multi-head attention ------------------------------
# Takes the fused (B, S, 3H) QKV slab; the head split is done with in-VMEM lane slices,
# so no HBM transposes.  Output comes back directly in (B, S, H) layout.

def _mha_kernel(qkv_ref, o_ref, *, nh, dh, scale):
    H = nh * dh
    qkv = qkv_ref[0]                                   # (S, 3H) bf16, one VMEM load
    outs = []
    for h in range(nh):                                # static unroll over heads
        q = qkv[:, h * dh:(h + 1) * dh] * scale        # scale folded into q (small tile)
        k = qkv[:, H + h * dh:H + (h + 1) * dh]
        v = qkv[:, 2 * H + h * dh:2 * H + (h + 1) * dh]
        # q . k^T without an explicit transpose: contract both last dims on the MXU.
        s = jax.lax.dot_general(q, k, (((1,), (1,)), ((), ())),
                                preferred_element_type=jnp.float32)   # (S, S) f32
        s = s - jnp.max(s, axis=-1, keepdims=True)
        p = jnp.exp(s)
        p = p * pl.reciprocal(jnp.sum(p, axis=-1, keepdims=True), approx=True)
        ctx = jnp.dot(p.astype(v.dtype), v,
                      preferred_element_type=jnp.float32)             # (S, dh) f32
        outs.append(ctx)
    o_ref[0] = jnp.concatenate(outs, axis=-1).astype(o_ref.dtype)     # lane-dense store


def pallas_attention(qkv, nh, dh):
    """qkv: (B, S, 3H) bf16 -> context (B, S, H) bf16 (all heads per grid step)."""
    B, S, H3 = qkv.shape
    H = nh * dh
    return pl.pallas_call(
        functools.partial(_mha_kernel, nh=nh, dh=dh, scale=1.0 / math.sqrt(dh)),
        out_shape=jax.ShapeDtypeStruct((B, S, H), qkv.dtype),
        grid=(B,),
        in_specs=[pl.BlockSpec((1, S, H3), lambda b: (b, 0, 0))],
        out_specs=pl.BlockSpec((1, S, H), lambda b: (b, 0, 0)),
        compiler_params=pltpu.CompilerParams(dimension_semantics=("parallel",)),
    )(qkv)


# --------------------- fused vocab decoder + cross-entropy ---------------------
# Never materializes (B*S, V) logits in HBM: online max / LSE / picked-logit
# accumulation across V tiles in VMEM scratch; emits per-token NLL.

def _decoder_ce_kernel(h_ref, w_ref, b_ref, lbl_ref, o_ref, m_sc, l_sc, p_sc, *, tv):
    j = pl.program_id(1)

    @pl.when(j == 0)
    def _():
        m_sc[...] = jnp.full_like(m_sc, -jnp.inf)
        l_sc[...] = jnp.zeros_like(l_sc)
        p_sc[...] = jnp.zeros_like(p_sc)

    logits = jnp.dot(h_ref[...], w_ref[...],
                     preferred_element_type=jnp.float32)
    logits = logits + b_ref[...]                               # (tm, tv) f32

    labels = lbl_ref[...]                                      # (tm, 1) i32
    col = jax.lax.broadcasted_iota(jnp.int32, logits.shape, 1) + j * tv
    p_sc[...] += jnp.sum(jnp.where(col == labels, logits, 0.0),
                         axis=-1, keepdims=True)

    m_new = jnp.maximum(m_sc[...], jnp.max(logits, axis=-1, keepdims=True))
    l_sc[...] = l_sc[...] * jnp.exp(m_sc[...] - m_new) + jnp.sum(
        jnp.exp(logits - m_new), axis=-1, keepdims=True)
    m_sc[...] = m_new

    @pl.when(j == pl.num_programs(1) - 1)
    def _():
        o_ref[...] = m_sc[...] + jnp.log(l_sc[...]) - p_sc[...]   # per-token NLL


def pallas_decoder_cross_entropy(h, w, b, labels, tm=256, tv=512):
    """h: (M, H) bf16, w: (H, V) bf16, b: (V,) f32, labels: (M,) i32 -> scalar mean NLL."""
    M, H = h.shape
    V = w.shape[1]
    tm = min(tm, M)
    tv = min(tv, V)
    assert M % tm == 0 and V % tv == 0  # pad vocab to a multiple of 128 for real checkpoints

    nll = pl.pallas_call(
        functools.partial(_decoder_ce_kernel, tv=tv),
        out_shape=jax.ShapeDtypeStruct((M, 1), jnp.float32),
        grid=(M // tm, V // tv),
        in_specs=[
            pl.BlockSpec((tm, H), lambda i, j: (i, 0)),
            pl.BlockSpec((H, tv), lambda i, j: (0, j)),
            pl.BlockSpec((1, tv), lambda i, j: (0, j)),
            pl.BlockSpec((tm, 1), lambda i, j: (i, 0)),
        ],
        out_specs=pl.BlockSpec((tm, 1), lambda i, j: (i, 0)),
        scratch_shapes=[pltpu.VMEM((tm, 1), jnp.float32),
                        pltpu.VMEM((tm, 1), jnp.float32),
                        pltpu.VMEM((tm, 1), jnp.float32)],
        compiler_params=pltpu.CompilerParams(
            dimension_semantics=("parallel", "arbitrary"),
            vmem_limit_bytes=_VMEM_LIMIT),
    )(h, w, b.reshape(1, V), labels.reshape(M, 1).astype(jnp.int32))
    # Final mean over M per-token scalars (tiny) in plain JAX.
    return jnp.mean(nll)


# ----------------------------- model assembly ------------------------------

def init_params(key, cfg):
    H = cfg["hidden_size"]
    V = cfg["vocab_size"]
    I = cfg["intermediate_size"]
    P = cfg["max_position_embeddings"]
    L = cfg["num_hidden_layers"]

    keys = iter(jax.random.split(key, 3 + 4 * L + 2))
    bf16 = jnp.bfloat16

    def nrm(shape, dtype=jnp.float32):
        return (0.02 * jax.random.normal(next(keys), shape, dtype=jnp.float32)).astype(dtype)

    params = {
        "word_emb": nrm((V, H)),
        "pos_emb": nrm((P, H)),
        "type_emb": nrm((2, H)),
        "emb_ln_g": jnp.ones((H,), jnp.float32),
        "emb_ln_b": jnp.zeros((H,), jnp.float32),
        "layers": [],
    }
    for _ in range(L):
        params["layers"].append({
            # fused Q|K|V projection weight (H, 3H)
            "qkv_w": nrm((H, 3 * H), bf16), "qkv_b": jnp.zeros((3 * H,), jnp.float32),
            "ao_w": nrm((H, H), bf16), "ao_b": jnp.zeros((H,), jnp.float32),
            "attn_ln_g": jnp.ones((H,), jnp.float32),
            "attn_ln_b": jnp.zeros((H,), jnp.float32),
            "i_w": nrm((H, I), bf16), "i_b": jnp.zeros((I,), jnp.float32),
            "o_w": nrm((I, H), bf16), "o_b": jnp.zeros((H,), jnp.float32),
            "out_ln_g": jnp.ones((H,), jnp.float32),
            "out_ln_b": jnp.zeros((H,), jnp.float32),
        })
    params["mlm"] = {
        "tr_w": nrm((H, H), bf16), "tr_b": jnp.zeros((H,), jnp.float32),
        "tr_ln_g": jnp.ones((H,), jnp.float32),
        "tr_ln_b": jnp.zeros((H,), jnp.float32),
        "dec_w": nrm((H, V), bf16), "dec_b": jnp.zeros((V,), jnp.float32),
    }
    return params


def encoder_layer(x, p, B, S, cfg):
    H = cfg["hidden_size"]
    nh = cfg["num_attention_heads"]
    dh = H // nh

    # fused QKV projection -> (B*S, 3H); attention consumes it as (B, S, 3H)
    qkv = pallas_fused_linear(x, p["qkv_w"], p["qkv_b"])
    ctx = pallas_attention(qkv.reshape(B, S, 3 * H), nh=nh, dh=dh)
    ctx = ctx.reshape(B * S, H)

    # attention output projection + bias + residual + LayerNorm (fused epilogue)
    x = pallas_fused_linear(ctx, p["ao_w"], p["ao_b"], residual=x,
                            gamma=p["attn_ln_g"], beta=p["attn_ln_b"], ln_eps=1e-12)

    # FFN: up-proj + GELU fused; down-proj + residual + LayerNorm fused
    inter = pallas_fused_linear(x, p["i_w"], p["i_b"], activation="gelu")
    x = pallas_fused_linear(inter, p["o_w"], p["o_b"], residual=x,
                            gamma=p["out_ln_g"], beta=p["out_ln_b"], ln_eps=1e-12)
    return x


def pretrain_bert_forward(params, input_ids, label_ids, cfg):
    B, S = input_ids.shape
    H = cfg["hidden_size"]

    # --- BertModel embeddings (gather glue in plain JAX) ---
    we = jnp.take(params["word_emb"], input_ids, axis=0)       # (B, S, H)
    pe = params["pos_emb"][:S][None, :, :]                     # (1, S, H)
    te = params["type_emb"][0][None, None, :]                  # (1, 1, H) (token_type=0)
    emb = (we + pe + te).reshape(B * S, H)
    x = pallas_layernorm(emb, params["emb_ln_g"], params["emb_ln_b"],
                         eps=1e-12, out_dtype=jnp.bfloat16)

    # --- BertModel encoder ---
    for layer_params in params["layers"]:
        x = encoder_layer(x, layer_params, B, S, cfg)

    # --- MLMHead transform: dense + GELU + LayerNorm (fused epilogue).
    # eps=1e-5 matches plain nn.LayerNorm default used in PredictionHeadTransform.
    p = params["mlm"]
    h = pallas_fused_linear(x, p["tr_w"], p["tr_b"], activation="gelu",
                            gamma=p["tr_ln_g"], beta=p["tr_ln_b"], ln_eps=1e-5)

    # --- fused vocab decoder + CrossEntropyLoss (logits never hit HBM) ---
    loss = pallas_decoder_cross_entropy(h, p["dec_w"], p["dec_b"],
                                        label_ids.reshape(-1))
    return loss


# ---------------------------------- main ------------------------------------

if __name__ == "__main__":
    cfg = dict(
        vocab_size=128,
        hidden_size=32,
        num_hidden_layers=2,
        num_attention_heads=4,
        intermediate_size=64,
        max_position_embeddings=16,
    )
    B, S = 2, 8

    key = jax.random.PRNGKey(0)
    pkey, ikey, lkey = jax.random.split(key, 3)
    params = init_params(pkey, cfg)

    input_ids = jax.random.randint(ikey, (B, S), 0, cfg["vocab_size"], dtype=jnp.int32)
    label_ids = jax.random.randint(lkey, (B, S), 0, cfg["vocab_size"], dtype=jnp.int32)

    fwd = jax.jit(lambda p, i, l: pretrain_bert_forward(p, i, l, cfg))
    loss = fwd(params, input_ids, label_ids)
    jax.block_until_ready(loss)
    assert loss.shape == () and bool(jnp.isfinite(loss))
    print("KERNEL_OK")
</pallas_src>

<mosaic_0001>
module attributes {stable_mosaic.version = 11 : i64} {
  func.func @_fused_linear_kernel(%arg0: i32, %arg1: i32, %arg2: i32, %arg3: memref<16x32xbf16, #tpu.memory_space<vmem>>, %arg4: memref<32x96xbf16, #tpu.memory_space<vmem>>, %arg5: memref<1x96xf32, #tpu.memory_space<vmem>>, %arg6: memref<16x96xbf16, #tpu.memory_space<vmem>>, %arg7: memref<16x96xf32, #tpu.memory_space<vmem>>) attributes {dimension_semantics = [#tpu.dimension_semantics<parallel>, #tpu.dimension_semantics<parallel>, #tpu.dimension_semantics<arbitrary>], iteration_bounds = array<i64: 1, 1, 1>, scalar_prefetch = 0 : i64, scratch_operands = 1 : i64, tpu.core_type = #tpu.core_type<tc>, window_params = [{transform_indices = @transform_0, window_bounds = array<i64: 16, 32>}, {transform_indices = @transform_1, window_bounds = array<i64: 32, 96>}, {transform_indices = @transform_2, window_bounds = array<i64: 1, 96>}, {transform_indices = @transform_3, window_bounds = array<i64: 16, 96>}]} {
    %c0_i32 = arith.constant 0 : i32
    %0 = arith.cmpi eq, %arg2, %c0_i32 : i32
    %1 = arith.extui %0 : i1 to i32
    %c0_i32_0 = arith.constant 0 : i32
    %2 = arith.cmpi ne, %1, %c0_i32_0 : i32
    scf.if %2 {
      %cst_10 = arith.constant 0.000000e+00 : f32
      %12 = vector.broadcast %cst_10 : f32 to vector<16x96xf32>
      %c0_11 = arith.constant 0 : index
      %c0_12 = arith.constant 0 : index
      %13 = vector.load %arg7[%c0_11, %c0_12] : memref<16x96xf32, #tpu.memory_space<vmem>>, vector<16x96xf32>
      tpu.vector_store %arg7[%c0_11, %c0_12], %12 {strides = array<i32>} : memref<16x96xf32, #tpu.memory_space<vmem>>, vector<16x96xf32>,
    } else {
    }
    %c0 = arith.constant 0 : index
    %c0_1 = arith.constant 0 : index
    %3 = vector.load %arg7[%c0, %c0_1] : memref<16x96xf32, #tpu.memory_space<vmem>>, vector<16x96xf32>
    %c0_2 = arith.constant 0 : index
    %c0_3 = arith.constant 0 : index
    %4 = vector.load %arg3[%c0_2, %c0_3] : memref<16x32xbf16, #tpu.memory_space<vmem>>, vector<16x32xbf16>
    %c0_4 = arith.constant 0 : index
    %c0_5 = arith.constant 0 : index
    %5 = vector.load %arg4[%c0_4, %c0_5] : memref<32x96xbf16, #tpu.memory_space<vmem>>, vector<32x96xbf16>
    %cst = arith.constant dense<0.000000e+00> : vector<16x96xf32>
    %6 = tpu.matmul %4, %5, %cst {dimension_numbers = #tpu.dot_dimension_numbers<[1], [0], [0], [1], [0, 0, 1, 1], [], []>} : vector<16x32xbf16>, vector<32x96xbf16>, vector<16x96xf32> -> vector<16x96xf32>
    %7 = arith.addf %3, %6 : vector<16x96xf32>
    %c0_6 = arith.constant 0 : index
    %c0_7 = arith.constant 0 : index
    %8 = vector.load %arg7[%c0_6, %c0_7] : memref<16x96xf32, #tpu.memory_space<vmem>>, vector<16x96xf32>
    tpu.vector_store %arg7[%c0_6, %c0_7], %7 {strides = array<i32>} : memref<16x96xf32, #tpu.memory_space<vmem>>, vector<16x96xf32>,
    %c0_i32_8 = arith.constant 0 : i32
    %9 = arith.cmpi eq, %arg2, %c0_i32_8 : i32
    %10 = arith.extui %9 : i1 to i32
    %c0_i32_9 = arith.constant 0 : i32
    %11 = arith.cmpi ne, %10, %c0_i32_9 : i32
    scf.if %11 {
      %c0_10 = arith.constant 0 : index
      %c0_11 = arith.constant 0 : index
      %12 = vector.load %arg7[%c0_10, %c0_11] : memref<16x96xf32, #tpu.memory_space<vmem>>, vector<16x96xf32>
      %c0_12 = arith.constant 0 : index
      %c0_13 = arith.constant 0 : index
      %13 = vector.load %arg5[%c0_12, %c0_13] : memref<1x96xf32, #tpu.memory_space<vmem>>, vector<1x96xf32>
      %14 = vector.broadcast %13 : vector<1x96xf32> to vector<16x96xf32>
      %15 = arith.addf %12, %14 : vector<16x96xf32>
      %16 = arith.truncf %15 : vector<16x96xf32> to vector<16x96xbf16>
      %c0_14 = arith.constant 0 : index
      %c0_15 = arith.constant 0 : index
      %17 = vector.load %arg6[%c0_14, %c0_15] : memref<16x96xbf16, #tpu.memory_space<vmem>>, vector<16x96xbf16>
      tpu.vector_store %arg6[%c0_14, %c0_15], %16 {strides = array<i32>} : memref<16x96xbf16, #tpu.memory_space<vmem>>, vector<16x96xbf16>,
    } else {
    }
    return
  }
  func.func @transform_0(%arg0: i32, %arg1: i32, %arg2: i32) -> (i32, i32) {
    %c0_i32 = arith.constant 0 : i32
    return %arg0, %arg2 : i32, i32
  }
  func.func @transform_1(%arg0: i32, %arg1: i32, %arg2: i32) -> (i32, i32) {
    %c0_i32 = arith.constant 0 : i32
    return %arg2, %arg1 : i32, i32
  }
  func.func @transform_2(%arg0: i32, %arg1: i32, %arg2: i32) -> (i32, i32) {
    %c0_i32 = arith.constant 0 : i32
    %c0_i32_0 = arith.constant 0 : i32
    return %c0_i32, %arg1 : i32, i32
  }
  func.func @transform_3(%arg0: i32, %arg1: i32, %arg2: i32) -> (i32, i32) {
    %c0_i32 = arith.constant 0 : i32
    return %arg0, %arg1 : i32, i32
  }
}

module attributes {stable_mosaic.version = 11 : i64} {
  func.func @_layernorm_kernel(%arg0: i32, %arg1: memref<16x32xf32, #tpu.memory_space<vmem>>, %arg2: memref<1x32xf32, #tpu.memory_space<vmem>>, %arg3: memref<1x32xf32, #tpu.memory_space<vmem>>, %arg4: memref<16x32xbf16, #tpu.memory_space<vmem>>) attributes {dimension_semantics = [#tpu.dimension_semantics<parallel>], iteration_bounds = array<i64: 1>, scalar_prefetch = 0 : i64, scratch_operands = 0 : i64, tpu.core_type = #tpu.core_type<tc>, window_params = [{transform_indices = @transform_0, window_bounds = array<i64: 16, 32>}, {pipeline_mode = #tpu.pipeline_mode<synchronous>, transform_indices = @transform_1, window_bounds = array<i64: 1, 32>}, {pipeline_mode = #tpu.pipeline_mode<synchronous>, transform_indices = @transform_2, window_bounds = array<i64: 1, 32>}, {transform_indices = @transform_3, window_bounds = array<i64: 16, 32>}]} {
    %c0 = arith.constant 0 : index
    %c0_0 = arith.constant 0 : index
    %0 = vector.load %arg1[%c0, %c0_0] : memref<16x32xf32, #tpu.memory_space<vmem>>, vector<16x32xf32>
    %cst = arith.constant dense<0.000000e+00> : vector<16xf32>
    %1 = vector.multi_reduction <add>, %0, %cst [1] : vector<16x32xf32> to vector<16xf32>
    %2 = vector.shape_cast %1 : vector<16xf32> to vector<16x1xf32>
    %cst_1 = arith.constant 3.200000e+01 : f32
    %3 = vector.broadcast %cst_1 : f32 to vector<16x1xf32>
    %4 = arith.divf %2, %3 : vector<16x1xf32>
    %5 = vector.broadcast %4 : vector<16x1xf32> to vector<16x32xf32>
    %6 = arith.subf %0, %5 : vector<16x32xf32>
    %7 = vector.broadcast %4 : vector<16x1xf32> to vector<16x32xf32>
    %8 = arith.subf %0, %7 : vector<16x32xf32>
    %9 = arith.mulf %6, %8 : vector<16x32xf32>
    %cst_2 = arith.constant dense<0.000000e+00> : vector<16xf32>
    %10 = vector.multi_reduction <add>, %9, %cst_2 [1] : vector<16x32xf32> to vector<16xf32>
    %11 = vector.shape_cast %10 : vector<16xf32> to vector<16x1xf32>
    %cst_3 = arith.constant 3.200000e+01 : f32
    %12 = vector.broadcast %cst_3 : f32 to vector<16x1xf32>
    %13 = arith.divf %11, %12 : vector<16x1xf32>
    %14 = vector.broadcast %4 : vector<16x1xf32> to vector<16x32xf32>
    %15 = arith.subf %0, %14 : vector<16x32xf32>
    %cst_4 = arith.constant 9.99999996E-13 : f32
    %16 = vector.broadcast %cst_4 : f32 to vector<16x1xf32>
    %17 = arith.addf %13, %16 : vector<16x1xf32>
    %18 = math.rsqrt %17 : vector<16x1xf32>
    %19 = vector.broadcast %18 : vector<16x1xf32> to vector<16x32xf32>
    %20 = arith.mulf %15, %19 : vector<16x32xf32>
    %c0_5 = arith.constant 0 : index
    %c0_6 = arith.constant 0 : index
    %21 = vector.load %arg2[%c0_5, %c0_6] : memref<1x32xf32, #tpu.memory_space<vmem>>, vector<1x32xf32>
    %22 = vector.broadcast %21 : vector<1x32xf32> to vector<16x32xf32>
    %23 = arith.mulf %20, %22 : vector<16x32xf32>
    %c0_7 = arith.constant 0 : index
    %c0_8 = arith.constant 0 : index
    %24 = vector.load %arg3[%c0_7, %c0_8] : memref<1x32xf32, #tpu.memory_space<vmem>>, vector<1x32xf32>
    %25 = vector.broadcast %24 : vector<1x32xf32> to vector<16x32xf32>
    %26 = arith.addf %23, %25 : vector<16x32xf32>
    %27 = arith.truncf %26 : vector<16x32xf32> to vector<16x32xbf16>
    %c0_9 = arith.constant 0 : index
    %c0_10 = arith.constant 0 : index
    %28 = vector.load %arg4[%c0_9, %c0_10] : memref<16x32xbf16, #tpu.memory_space<vmem>>, vector<16x32xbf16>
    tpu.vector_store %arg4[%c0_9, %c0_10], %27 {strides = array<i32>} : memref<16x32xbf16, #tpu.memory_space<vmem>>, vector<16x32xbf16>,
    return
  }
  func.func @transform_0(%arg0: i32) -> (i32, i32) {
    %c0_i32 = arith.constant 0 : i32
    %c0_i32_0 = arith.constant 0 : i32
    return %arg0, %c0_i32 : i32, i32
  }
  func.func @transform_1(%arg0: i32) -> (i32, i32) {
    %c0_i32 = arith.constant 0 : i32
    %c0_i32_0 = arith.constant 0 : i32
    %c0_i32_1 = arith.constant 0 : i32
    return %c0_i32, %c0_i32_0 : i32, i32
  }
  func.func @transform_2(%arg0: i32) -> (i32, i32) {
    %c0_i32 = arith.constant 0 : i32
    %c0_i32_0 = arith.constant 0 : i32
    %c0_i32_1 = arith.constant 0 : i32
    return %c0_i32, %c0_i32_0 : i32, i32
  }
  func.func @transform_3(%arg0: i32) -> (i32, i32) {
    %c0_i32 = arith.constant 0 : i32
    %c0_i32_0 = arith.constant 0 : i32
    return %arg0, %c0_i32 : i32, i32
  }
}

module attributes {stable_mosaic.version = 11 : i64} {
  func.func @_mha_kernel(%arg0: i32, %arg1: memref<1x8x96xbf16, #tpu.memory_space<vmem>>, %arg2: memref<1x8x32xbf16, #tpu.memory_space<vmem>>) attributes {dimension_semantics = [#tpu.dimension_semantics<parallel>], iteration_bounds = array<i64: 2>, scalar_prefetch = 0 : i64, scratch_operands = 0 : i64, tpu.core_type = #tpu.core_type<tc>, window_params = [{transform_indices = @transform_0, window_bounds = array<i64: 1, 8, 96>}, {transform_indices = @transform_1, window_bounds = array<i64: 1, 8, 32>}]} {
    %c0 = arith.constant 0 : index
    %c0_0 = arith.constant 0 : index
    %c0_1 = arith.constant 0 : index
    %0 = vector.load %arg1[%c0, %c0_0, %c0_1] : memref<1x8x96xbf16, #tpu.memory_space<vmem>>, vector<1x8x96xbf16>
    %1 = vector.shape_cast %0 : vector<1x8x96xbf16> to vector<8x96xbf16>
    %2 = vector.extract_strided_slice %1 {offsets = [0, 0], sizes = [8, 8], strides = [1, 1]} : vector<8x96xbf16> to vector<8x8xbf16>
    %cst = arith.constant 3.535160e-01 : bf16
    %3 = vector.broadcast %cst : bf16 to vector<8x8xbf16>
    %4 = arith.mulf %2, %3 : vector<8x8xbf16>
    %5 = vector.extract_strided_slice %1 {offsets = [0, 32], sizes = [8, 8], strides = [1, 1]} : vector<8x96xbf16> to vector<8x8xbf16>
    %6 = vector.extract_strided_slice %1 {offsets = [0, 64], sizes = [8, 8], strides = [1, 1]} : vector<8x96xbf16> to vector<8x8xbf16>
    %cst_2 = arith.constant dense<0.000000e+00> : vector<8x8xf32>
    %7 = tpu.matmul %4, %5, %cst_2 {dimension_numbers = #tpu.dot_dimension_numbers<[1], [1], [0], [0], [0, 0, 1, 0], [], []>} : vector<8x8xbf16>, vector<8x8xbf16>, vector<8x8xf32> -> vector<8x8xf32>
    %cst_3 = arith.constant dense<0xFF800000> : vector<8xf32>
    %8 = vector.multi_reduction <maximumf>, %7, %cst_3 [1] : vector<8x8xf32> to vector<8xf32>
    %9 = vector.shape_cast %8 : vector<8xf32> to vector<8x1xf32>
    %10 = vector.broadcast %9 : vector<8x1xf32> to vector<8x8xf32>
    %11 = arith.subf %7, %10 : vector<8x8xf32>
    %12 = math.exp %11 : vector<8x8xf32>
    %cst_4 = arith.constant dense<0.000000e+00> : vector<8xf32>
    %13 = vector.multi_reduction <add>, %12, %cst_4 [1] : vector<8x8xf32> to vector<8xf32>
    %14 = vector.shape_cast %13 : vector<8xf32> to vector<8x1xf32>
    %15 = tpu.reciprocal %14 {approx = true} : vector<8x1xf32> -> vector<8x1xf32>
    %16 = vector.broadcast %15 : vector<8x1xf32> to vector<8x8xf32>
    %17 = arith.mulf %12, %16 : vector<8x8xf32>
    %18 = arith.truncf %17 : vector<8x8xf32> to vector<8x8xbf16>
    %cst_5 = arith.constant dense<0.000000e+00> : vector<8x8xf32>
    %19 = tpu.matmul %18, %6, %cst_5 {dimension_numbers = #tpu.dot_dimension_numbers<[1], [0], [0], [1], [0, 0, 1, 1], [], []>} : vector<8x8xbf16>, vector<8x8xbf16>, vector<8x8xf32> -> vector<8x8xf32>
    %20 = vector.extract_strided_slice %1 {offsets = [0, 8], sizes = [8, 8], strides = [1, 1]} : vector<8x96xbf16> to vector<8x8xbf16>
    %cst_6 = arith.constant 3.535160e-01 : bf16
    %21 = vector.broadcast %cst_6 : bf16 to vector<8x8xbf16>
    %22 = arith.mulf %20, %21 : vector<8x8xbf16>
    %23 = vector.extract_strided_slice %1 {offsets = [0, 40], sizes = [8, 8], strides = [1, 1]} : vector<8x96xbf16> to vector<8x8xbf16>
    %24 = vector.extract_strided_slice %1 {offsets = [0, 72], sizes = [8, 8], strides = [1, 1]} : vector<8x96xbf16> to vector<8x8xbf16>
    %cst_7 = arith.constant dense<0.000000e+00> : vector<8x8xf32>
    %25 = tpu.matmul %22, %23, %cst_7 {dimension_numbers = #tpu.dot_dimension_numbers<[1], [1], [0], [0], [0, 0, 1, 0], [], []>} : vector<8x8xbf16>, vector<8x8xbf16>, vector<8x8xf32> -> vector<8x8xf32>
    %cst_8 = arith.constant dense<0xFF800000> : vector<8xf32>
    %26 = vector.multi_reduction <maximumf>, %25, %cst_8 [1] : vector<8x8xf32> to vector<8xf32>
    %27 = vector.shape_cast %26 : vector<8xf32> to vector<8x1xf32>
    %28 = vector.broadcast %27 : vector<8x1xf32> to vector<8x8xf32>
    %29 = arith.subf %25, %28 : vector<8x8xf32>
    %30 = math.exp %29 : vector<8x8xf32>
    %cst_9 = arith.constant dense<0.000000e+00> : vector<8xf32>
    %31 = vector.multi_reduction <add>, %30, %cst_9 [1] : vector<8x8xf32> to vector<8xf32>
    %32 = vector.shape_cast %31 : vector<8xf32> to vector<8x1xf32>
    %33 = tpu.reciprocal %32 {approx = true} : vector<8x1xf32> -> vector<8x1xf32>
    %34 = vector.broadcast %33 : vector<8x1xf32> to vector<8x8xf32>
    %35 = arith.mulf %30, %34 : vector<8x8xf32>
    %36 = arith.truncf %35 : vector<8x8xf32> to vector<8x8xbf16>
    %cst_10 = arith.constant dense<0.000000e+00> : vector<8x8xf32>
    %37 = tpu.matmul %36, %24, %cst_10 {dimension_numbers = #tpu.dot_dimension_numbers<[1], [0], [0], [1], [0, 0, 1, 1], [], []>} : vector<8x8xbf16>, vector<8x8xbf16>, vector<8x8xf32> -> vector<8x8xf32>
    %38 = vector.extract_strided_slice %1 {offsets = [0, 16], sizes = [8, 8], strides = [1, 1]} : vector<8x96xbf16> to vector<8x8xbf16>
    %cst_11 = arith.constant 3.535160e-01 : bf16
    %39 = vector.broadcast %cst_11 : bf16 to vector<8x8xbf16>
    %40 = arith.mulf %38, %39 : vector<8x8xbf16>
    %41 = vector.extract_strided_slice %1 {offsets = [0, 48], sizes = [8, 8], strides = [1, 1]} : vector<8x96xbf16> to vector<8x8xbf16>
    %42 = vector.extract_strided_slice %1 {offsets = [0, 80], sizes = [8, 8], strides = [1, 1]} : vector<8x96xbf16> to vector<8x8xbf16>
    %cst_12 = arith.constant dense<0.000000e+00> : vector<8x8xf32>
    %43 = tpu.matmul %40, %41, %cst_12 {dimension_numbers = #tpu.dot_dimension_numbers<[1], [1], [0], [0], [0, 0, 1, 0], [], []>} : vector<8x8xbf16>, vector<8x8xbf16>, vector<8x8xf32> -> vector<8x8xf32>
    %cst_13 = arith.constant dense<0xFF800000> : vector<8xf32>
    %44 = vector.multi_reduction <maximumf>, %43, %cst_13 [1] : vector<8x8xf32> to vector<8xf32>
    %45 = vector.shape_cast %44 : vector<8xf32> to vector<8x1xf32>
    %46 = vector.broadcast %45 : vector<8x1xf32> to vector<8x8xf32>
    %47 = arith.subf %43, %46 : vector<8x8xf32>
    %48 = math.exp %47 : vector<8x8xf32>
    %cst_14 = arith.constant dense<0.000000e+00> : vector<8xf32>
    %49 = vector.multi_reduction <add>, %48, %cst_14 [1] : vector<8x8xf32> to vector<8xf32>
    %50 = vector.shape_cast %49 : vector<8xf32> to vector<8x1xf32>
    %51 = tpu.reciprocal %50 {approx = true} : vector<8x1xf32> -> vector<8x1xf32>
    %52 = vector.broadcast %51 : vector<8x1xf32> to vector<8x8xf32>
    %53 = arith.mulf %48, %52 : vector<8x8xf32>
    %54 = arith.truncf %53 : vector<8x8xf32> to vector<8x8xbf16>
    %cst_15 = arith.constant dense<0.000000e+00> : vector<8x8xf32>
    %55 = tpu.matmul %54, %42, %cst_15 {dimension_numbers = #tpu.dot_dimension_numbers<[1], [0], [0], [1], [0, 0, 1, 1], [], []>} : vector<8x8xbf16>, vector<8x8xbf16>, vector<8x8xf32> -> vector<8x8xf32>
    %56 = vector.extract_strided_slice %1 {offsets = [0, 24], sizes = [8, 8], strides = [1, 1]} : vector<8x96xbf16> to vector<8x8xbf16>
    %cst_16 = arith.constant 3.535160e-01 : bf16
    %57 = vector.broadcast %cst_16 : bf16 to vector<8x8xbf16>
    %58 = arith.mulf %56, %57 : vector<8x8xbf16>
    %59 = vector.extract_strided_slice %1 {offsets = [0, 56], sizes = [8, 8], strides = [1, 1]} : vector<8x96xbf16> to vector<8x8xbf16>
    %60 = vector.extract_strided_slice %1 {offsets = [0, 88], sizes = [8, 8], strides = [1, 1]} : vector<8x96xbf16> to vector<8x8xbf16>
    %cst_17 = arith.constant dense<0.000000e+00> : vector<8x8xf32>
    %61 = tpu.matmul %58, %59, %cst_17 {dimension_numbers = #tpu.dot_dimension_numbers<[1], [1], [0], [0], [0, 0, 1, 0], [], []>} : vector<8x8xbf16>, vector<8x8xbf16>, vector<8x8xf32> -> vector<8x8xf32>
    %cst_18 = arith.constant dense<0xFF800000> : vector<8xf32>
    %62 = vector.multi_reduction <maximumf>, %61, %cst_18 [1] : vector<8x8xf32> to vector<8xf32>
    %63 = vector.shape_cast %62 : vector<8xf32> to vector<8x1xf32>
    %64 = vector.broadcast %63 : vector<8x1xf32> to vector<8x8xf32>
    %65 = arith.subf %61, %64 : vector<8x8xf32>
    %66 = math.exp %65 : vector<8x8xf32>
    %cst_19 = arith.constant dense<0.000000e+00> : vector<8xf32>
    %67 = vector.multi_reduction <add>, %66, %cst_19 [1] : vector<8x8xf32> to vector<8xf32>
    %68 = vector.shape_cast %67 : vector<8xf32> to vector<8x1xf32>
    %69 = tpu.reciprocal %68 {approx = true} : vector<8x1xf32> -> vector<8x1xf32>
    %70 = vector.broadcast %69 : vector<8x1xf32> to vector<8x8xf32>
    %71 = arith.mulf %66, %70 : vector<8x8xf32>
    %72 = arith.truncf %71 : vector<8x8xf32> to vector<8x8xbf16>
    %cst_20 = arith.constant dense<0.000000e+00> : vector<8x8xf32>
    %73 = tpu.matmul %72, %60, %cst_20 {dimension_numbers = #tpu.dot_dimension_numbers<[1], [0], [0], [1], [0, 0, 1, 1], [], []>} : vector<8x8xbf16>, vector<8x8xbf16>, vector<8x8xf32> -> vector<8x8xf32>
    %74 = tpu.concatenate %19, %37, %55, %73 in 1 : vector<8x8xf32>, vector<8x8xf32>, vector<8x8xf32>, vector<8x8xf32> -> vector<8x32xf32>
    %75 = arith.truncf %74 : vector<8x32xf32> to vector<8x32xbf16>
    %c0_21 = arith.constant 0 : index
    %c0_22 = arith.constant 0 : index
    %c0_23 = arith.constant 0 : index
    %76 = vector.load %arg2[%c0_21, %c0_22, %c0_23] : memref<1x8x32xbf16, #tpu.memory_space<vmem>>, vector<1x8x32xbf16>
    %77 = vector.shape_cast %76 : vector<1x8x32xbf16> to vector<8x32xbf16>
    %78 = vector.shape_cast %75 : vector<8x32xbf16> to vector<1x8x32xbf16>
    tpu.vector_store %arg2[%c0_21, %c0_22, %c0_23], %78 {strides = array<i32>} : memref<1x8x32xbf16, #tpu.memory_space<vmem>>, vector<1x8x32xbf16>,
    return
  }
  func.func @transform_0(%arg0: i32) -> (i32, i32, i32) {
    %c0_i32 = arith.constant 0 : i32
    %c0_i32_0 = arith.constant 0 : i32
    %c0_i32_1 = arith.constant 0 : i32
    return %arg0, %c0_i32, %c0_i32_0 : i32, i32, i32
  }
  func.func @transform_1(%arg0: i32) -> (i32, i32, i32) {
    %c0_i32 = arith.constant 0 : i32
    %c0_i32_0 = arith.constant 0 : i32
    %c0_i32_1 = arith.constant 0 : i32
    return %arg0, %c0_i32, %c0_i32_0 : i32, i32, i32
  }
}

module attributes {stable_mosaic.version = 11 : i64} {
  func.func @_fused_linear_kernel(%arg0: i32, %arg1: i32, %arg2: i32, %arg3: memref<16x32xbf16, #tpu.memory_space<vmem>>, %arg4: memref<32x32xbf16, #tpu.memory_space<vmem>>, %arg5: memref<1x32xf32, #tpu.memory_space<vmem>>, %arg6: memref<16x32xbf16, #tpu.memory_space<vmem>>, %arg7: memref<1x32xf32, #tpu.memory_space<vmem>>, %arg8: memref<1x32xf32, #tpu.memory_space<vmem>>, %arg9: memref<16x32xbf16, #tpu.memory_space<vmem>>, %arg10: memref<16x32xf32, #tpu.memory_space<vmem>>) attributes {dimension_semantics = [#tpu.dimension_semantics<parallel>, #tpu.dimension_semantics<parallel>, #tpu.dimension_semantics<arbitrary>], iteration_bounds = array<i64: 1, 1, 1>, scalar_prefetch = 0 : i64, scratch_operands = 1 : i64, tpu.core_type = #tpu.core_type<tc>, window_params = [{transform_indices = @transform_0, window_bounds = array<i64: 16, 32>}, {transform_indices = @transform_1, window_bounds = array<i64: 32, 32>}, {transform_indices = @transform_2, window_bounds = array<i64: 1, 32>}, {transform_indices = @transform_3, window_bounds = array<i64: 16, 32>}, {transform_indices = @transform_4, window_bounds = array<i64: 1, 32>}, {transform_indices = @transform_5, window_bounds = array<i64: 1, 32>}, {transform_indices = @transform_6, window_bounds = array<i64: 16, 32>}]} {
    %c0_i32 = arith.constant 0 : i32
    %0 = arith.cmpi eq, %arg2, %c0_i32 : i32
    %1 = arith.extui %0 : i1 to i32
    %c0_i32_0 = arith.constant 0 : i32
    %2 = arith.cmpi ne, %1, %c0_i32_0 : i32
    scf.if %2 {
      %cst_10 = arith.constant 0.000000e+00 : f32
      %12 = vector.broadcast %cst_10 : f32 to vector<16x32xf32>
      %c0_11 = arith.constant 0 : index
      %c0_12 = arith.constant 0 : index
      %13 = vector.load %arg10[%c0_11, %c0_12] : memref<16x32xf32, #tpu.memory_space<vmem>>, vector<16x32xf32>
      tpu.vector_store %arg10[%c0_11, %c0_12], %12 {strides = array<i32>} : memref<16x32xf32, #tpu.memory_space<vmem>>, vector<16x32xf32>,
    } else {
    }
    %c0 = arith.constant 0 : index
    %c0_1 = arith.constant 0 : index
    %3 = vector.load %arg10[%c0, %c0_1] : memref<16x32xf32, #tpu.memory_space<vmem>>, vector<16x32xf32>
    %c0_2 = arith.constant 0 : index
    %c0_3 = arith.constant 0 : index
    %4 = vector.load %arg3[%c0_2, %c0_3] : memref<16x32xbf16, #tpu.memory_space<vmem>>, vector<16x32xbf16>
    %c0_4 = arith.constant 0 : index
    %c0_5 = arith.constant 0 : index
    %5 = vector.load %arg4[%c0_4, %c0_5] : memref<32x32xbf16, #tpu.memory_space<vmem>>, vector<32x32xbf16>
    %cst = arith.constant dense<0.000000e+00> : vector<16x32xf32>
    %6 = tpu.matmul %4, %5, %cst {dimension_numbers = #tpu.dot_dimension_numbers<[1], [0], [0], [1], [0, 0, 1, 1], [], []>} : vector<16x32xbf16>, vector<32x32xbf16>, vector<16x32xf32> -> vector<16x32xf32>
    %7 = arith.addf %3, %6 : vector<16x32xf32>
    %c0_6 = arith.constant 0 : index
    %c0_7 = arith.constant 0 : index
    %8 = vector.load %arg10[%c0_6, %c0_7] : memref<16x32xf32, #tpu.memory_space<vmem>>, vector<16x32xf32>
    tpu.vector_store %arg10[%c0_6, %c0_7], %7 {strides = array<i32>} : memref<16x32xf32, #tpu.memory_space<vmem>>, vector<16x32xf32>,
    %c0_i32_8 = arith.constant 0 : i32
    %9 = arith.cmpi eq, %arg2, %c0_i32_8 : i32
    %10 = arith.extui %9 : i1 to i32
    %c0_i32_9 = arith.constant 0 : i32
    %11 = arith.cmpi ne, %10, %c0_i32_9 : i32
    scf.if %11 {
      %c0_10 = arith.constant 0 : index
      %c0_11 = arith.constant 0 : index
      %12 = vector.load %arg10[%c0_10, %c0_11] : memref<16x32xf32, #tpu.memory_space<vmem>>, vector<16x32xf32>
      %c0_12 = arith.constant 0 : index
      %c0_13 = arith.constant 0 : index
      %13 = vector.load %arg5[%c0_12, %c0_13] : memref<1x32xf32, #tpu.memory_space<vmem>>, vector<1x32xf32>
      %14 = vector.broadcast %13 : vector<1x32xf32> to vector<16x32xf32>
      %15 = arith.addf %12, %14 : vector<16x32xf32>
      %c0_14 = arith.constant 0 : index
      %c0_15 = arith.constant 0 : index
      %16 = vector.load %arg6[%c0_14, %c0_15] : memref<16x32xbf16, #tpu.memory_space<vmem>>, vector<16x32xbf16>
      %17 = arith.extf %16 : vector<16x32xbf16> to vector<16x32xf32>
      %18 = arith.addf %15, %17 : vector<16x32xf32>
      %cst_16 = arith.constant dense<0.000000e+00> : vector<16xf32>
      %19 = vector.multi_reduction <add>, %18, %cst_16 [1] : vector<16x32xf32> to vector<16xf32>
      %20 = vector.shape_cast %19 : vector<16xf32> to vector<16x1xf32>
      %cst_17 = arith.constant 3.200000e+01 : f32
      %21 = vector.broadcast %cst_17 : f32 to vector<16x1xf32>
      %22 = arith.divf %20, %21 : vector<16x1xf32>
      %23 = vector.broadcast %22 : vector<16x1xf32> to vector<16x32xf32>
      %24 = arith.subf %18, %23 : vector<16x32xf32>
      %25 = vector.broadcast %22 : vector<16x1xf32> to vector<16x32xf32>
      %26 = arith.subf %18, %25 : vector<16x32xf32>
      %27 = arith.mulf %24, %26 : vector<16x32xf32>
      %cst_18 = arith.constant dense<0.000000e+00> : vector<16xf32>
      %28 = vector.multi_reduction <add>, %27, %cst_18 [1] : vector<16x32xf32> to vector<16xf32>
      %29 = vector.shape_cast %28 : vector<16xf32> to vector<16x1xf32>
      %cst_19 = arith.constant 3.200000e+01 : f32
      %30 = vector.broadcast %cst_19 : f32 to vector<16x1xf32>
      %31 = arith.divf %29, %30 : vector<16x1xf32>
      %32 = vector.broadcast %22 : vector<16x1xf32> to vector<16x32xf32>
      %33 = arith.subf %18, %32 : vector<16x32xf32>
      %cst_20 = arith.constant 9.99999996E-13 : f32
      %34 = vector.broadcast %cst_20 : f32 to vector<16x1xf32>
      %35 = arith.addf %31, %34 : vector<16x1xf32>
      %36 = math.rsqrt %35 : vector<16x1xf32>
      %37 = vector.broadcast %36 : vector<16x1xf32> to vector<16x32xf32>
      %38 = arith.mulf %33, %37 : vector<16x32xf32>
      %c0_21 = arith.constant 0 : index
      %c0_22 = arith.constant 0 : index
      %39 = vector.load %arg7[%c0_21, %c0_22] : memref<1x32xf32, #tpu.memory_space<vmem>>, vector<1x32xf32>
      %40 = vector.broadcast %39 : vector<1x32xf32> to vector<16x32xf32>
      %41 = arith.mulf %38, %40 : vector<16x32xf32>
      %c0_23 = arith.constant 0 : index
      %c0_24 = arith.constant 0 : index
      %42 = vector.load %arg8[%c0_23, %c0_24] : memref<1x32xf32, #tpu.memory_space<vmem>>, vector<1x32xf32>
      %43 = vector.broadcast %42 : vector<1x32xf32> to vector<16x32xf32>
      %44 = arith.addf %41, %43 : vector<16x32xf32>
      %45 = arith.truncf %44 : vector<16x32xf32> to vector<16x32xbf16>
      %c0_25 = arith.constant 0 : index
      %c0_26 = arith.constant 0 : index
      %46 = vector.load %arg9[%c0_25, %c0_26] : memref<16x32xbf16, #tpu.memory_space<vmem>>, vector<16x32xbf16>
      tpu.vector_store %arg9[%c0_25, %c0_26], %45 {strides = array<i32>} : memref<16x32xbf16, #tpu.memory_space<vmem>>, vector<16x32xbf16>,
    } else {
    }
    return
  }
  func.func @transform_0(%arg0: i32, %arg1: i32, %arg2: i32) -> (i32, i32) {
    %c0_i32 = arith.constant 0 : i32
    return %arg0, %arg2 : i32, i32
  }
  func.func @transform_1(%arg0: i32, %arg1: i32, %arg2: i32) -> (i32, i32) {
    %c0_i32 = arith.constant 0 : i32
    return %arg2, %arg1 : i32, i32
  }
  func.func @transform_2(%arg0: i32, %arg1: i32, %arg2: i32) -> (i32, i32) {
    %c0_i32 = arith.constant 0 : i32
    %c0_i32_0 = arith.constant 0 : i32
    return %c0_i32, %arg1 : i32, i32
  }
  func.func @transform_3(%arg0: i32, %arg1: i32, %arg2: i32) -> (i32, i32) {
    %c0_i32 = arith.constant 0 : i32
    return %arg0, %arg1 : i32, i32
  }
  func.func @transform_4(%arg0: i32, %arg1: i32, %arg2: i32) -> (i32, i32) {
    %c0_i32 = arith.constant 0 : i32
    %c0_i32_0 = arith.constant 0 : i32
    return %c0_i32, %arg1 : i32, i32
  }
  func.func @transform_5(%arg0: i32, %arg1: i32, %arg2: i32) -> (i32, i32) {
    %c0_i32 = arith.constant 0 : i32
    %c0_i32_0 = arith.constant 0 : i32
    return %c0_i32, %arg1 : i32, i32
  }
  func.func @transform_6(%arg0: i32, %arg1: i32, %arg2: i32) -> (i32, i32) {
    %c0_i32 = arith.constant 0 : i32
    return %arg0, %arg1 : i32, i32
  }
}

module attributes {stable_mosaic.version = 11 : i64} {
  func.func @_fused_linear_kernel(%arg0: i32, %arg1: i32, %arg2: i32, %arg3: memref<16x32xbf16, #tpu.memory_space<vmem>>, %arg4: memref<32x64xbf16, #tpu.memory_space<vmem>>, %arg5: memref<1x64xf32, #tpu.memory_space<vmem>>, %arg6: memref<16x64xbf16, #tpu.memory_space<vmem>>, %arg7: memref<16x64xf32, #tpu.memory_space<vmem>>) attributes {dimension_semantics = [#tpu.dimension_semantics<parallel>, #tpu.dimension_semantics<parallel>, #tpu.dimension_semantics<arbitrary>], iteration_bounds = array<i64: 1, 1, 1>, scalar_prefetch = 0 : i64, scratch_operands = 1 : i64, tpu.core_type = #tpu.core_type<tc>, window_params = [{transform_indices = @transform_0, window_bounds = array<i64: 16, 32>}, {transform_indices = @transform_1, window_bounds = array<i64: 32, 64>}, {transform_indices = @transform_2, window_bounds = array<i64: 1, 64>}, {transform_indices = @transform_3, window_bounds = array<i64: 16, 64>}]} {
    %c0_i32 = arith.constant 0 : i32
    %0 = arith.cmpi eq, %arg2, %c0_i32 : i32
    %1 = arith.extui %0 : i1 to i32
    %c0_i32_0 = arith.constant 0 : i32
    %2 = arith.cmpi ne, %1, %c0_i32_0 : i32
    scf.if %2 {
      %cst_10 = arith.constant 0.000000e+00 : f32
      %12 = vector.broadcast %cst_10 : f32 to vector<16x64xf32>
      %c0_11 = arith.constant 0 : index
      %c0_12 = arith.constant 0 : index
      %13 = vector.load %arg7[%c0_11, %c0_12] : memref<16x64xf32, #tpu.memory_space<vmem>>, vector<16x64xf32>
      tpu.vector_store %arg7[%c0_11, %c0_12], %12 {strides = array<i32>} : memref<16x64xf32, #tpu.memory_space<vmem>>, vector<16x64xf32>,
    } else {
    }
    %c0 = arith.constant 0 : index
    %c0_1 = arith.constant 0 : index
    %3 = vector.load %arg7[%c0, %c0_1] : memref<16x64xf32, #tpu.memory_space<vmem>>, vector<16x64xf32>
    %c0_2 = arith.constant 0 : index
    %c0_3 = arith.constant 0 : index
    %4 = vector.load %arg3[%c0_2, %c0_3] : memref<16x32xbf16, #tpu.memory_space<vmem>>, vector<16x32xbf16>
    %c0_4 = arith.constant 0 : index
    %c0_5 = arith.constant 0 : index
    %5 = vector.load %arg4[%c0_4, %c0_5] : memref<32x64xbf16, #tpu.memory_space<vmem>>, vector<32x64xbf16>
    %cst = arith.constant dense<0.000000e+00> : vector<16x64xf32>
    %6 = tpu.matmul %4, %5, %cst {dimension_numbers = #tpu.dot_dimension_numbers<[1], [0], [0], [1], [0, 0, 1, 1], [], []>} : vector<16x32xbf16>, vector<32x64xbf16>, vector<16x64xf32> -> vector<16x64xf32>
    %7 = arith.addf %3, %6 : vector<16x64xf32>
    %c0_6 = arith.constant 0 : index
    %c0_7 = arith.constant 0 : index
    %8 = vector.load %arg7[%c0_6, %c0_7] : memref<16x64xf32, #tpu.memory_space<vmem>>, vector<16x64xf32>
    tpu.vector_store %arg7[%c0_6, %c0_7], %7 {strides = array<i32>} : memref<16x64xf32, #tpu.memory_space<vmem>>, vector<16x64xf32>,
    %c0_i32_8 = arith.constant 0 : i32
    %9 = arith.cmpi eq, %arg2, %c0_i32_8 : i32
    %10 = arith.extui %9 : i1 to i32
    %c0_i32_9 = arith.constant 0 : i32
    %11 = arith.cmpi ne, %10, %c0_i32_9 : i32
    scf.if %11 {
      %c0_10 = arith.constant 0 : index
      %c0_11 = arith.constant 0 : index
      %12 = vector.load %arg7[%c0_10, %c0_11] : memref<16x64xf32, #tpu.memory_space<vmem>>, vector<16x64xf32>
      %c0_12 = arith.constant 0 : index
      %c0_13 = arith.constant 0 : index
      %13 = vector.load %arg5[%c0_12, %c0_13] : memref<1x64xf32, #tpu.memory_space<vmem>>, vector<1x64xf32>
      %14 = vector.broadcast %13 : vector<1x64xf32> to vector<16x64xf32>
      %15 = arith.addf %12, %14 : vector<16x64xf32>
      %cst_14 = arith.constant 5.000000e-01 : f32
      %16 = vector.broadcast %cst_14 : f32 to vector<16x64xf32>
      %17 = arith.mulf %16, %15 : vector<16x64xf32>
      %cst_15 = arith.constant 0.707106769 : f32
      %18 = vector.broadcast %cst_15 : f32 to vector<16x64xf32>
      %19 = arith.mulf %15, %18 : vector<16x64xf32>
      %20 = math.erf %19 : vector<16x64xf32>
      %cst_16 = arith.constant 1.000000e+00 : f32
      %21 = vector.broadcast %cst_16 : f32 to vector<16x64xf32>
      %22 = arith.addf %21, %20 : vector<16x64xf32>
      %23 = arith.mulf %17, %22 : vector<16x64xf32>
      %24 = arith.truncf %23 : vector<16x64xf32> to vector<16x64xbf16>
      %c0_17 = arith.constant 0 : index
      %c0_18 = arith.constant 0 : index
      %25 = vector.load %arg6[%c0_17, %c0_18] : memref<16x64xbf16, #tpu.memory_space<vmem>>, vector<16x64xbf16>
      tpu.vector_store %arg6[%c0_17, %c0_18], %24 {strides = array<i32>} : memref<16x64xbf16, #tpu.memory_space<vmem>>, vector<16x64xbf16>,
    } else {
    }
    return
  }
  func.func @transform_0(%arg0: i32, %arg1: i32, %arg2: i32) -> (i32, i32) {
    %c0_i32 = arith.constant 0 : i32
    return %arg0, %arg2 : i32, i32
  }
  func.func @transform_1(%arg0: i32, %arg1: i32, %arg2: i32) -> (i32, i32) {
    %c0_i32 = arith.constant 0 : i32
    return %arg2, %arg1 : i32, i32
  }
  func.func @transform_2(%arg0: i32, %arg1: i32, %arg2: i32) -> (i32, i32) {
    %c0_i32 = arith.constant 0 : i32
    %c0_i32_0 = arith.constant 0 : i32
    return %c0_i32, %arg1 : i32, i32
  }
  func.func @transform_3(%arg0: i32, %arg1: i32, %arg2: i32) -> (i32, i32) {
    %c0_i32 = arith.constant 0 : i32
    return %arg0, %arg1 : i32, i32
  }
}

module attributes {stable_mosaic.version = 11 : i64} {
  func.func @_fused_linear_kernel(%arg0: i32, %arg1: i32, %arg2: i32, %arg3: memref<16x64xbf16, #tpu.memory_space<vmem>>, %arg4: memref<64x32xbf16, #tpu.memory_space<vmem>>, %arg5: memref<1x32xf32, #tpu.memory_space<vmem>>, %arg6: memref<16x32xbf16, #tpu.memory_space<vmem>>, %arg7: memref<1x32xf32, #tpu.memory_space<vmem>>, %arg8: memref<1x32xf32, #tpu.memory_space<vmem>>, %arg9: memref<16x32xbf16, #tpu.memory_space<vmem>>, %arg10: memref<16x32xf32, #tpu.memory_space<vmem>>) attributes {dimension_semantics = [#tpu.dimension_semantics<parallel>, #tpu.dimension_semantics<parallel>, #tpu.dimension_semantics<arbitrary>], iteration_bounds = array<i64: 1, 1, 1>, scalar_prefetch = 0 : i64, scratch_operands = 1 : i64, tpu.core_type = #tpu.core_type<tc>, window_params = [{transform_indices = @transform_0, window_bounds = array<i64: 16, 64>}, {transform_indices = @transform_1, window_bounds = array<i64: 64, 32>}, {transform_indices = @transform_2, window_bounds = array<i64: 1, 32>}, {transform_indices = @transform_3, window_bounds = array<i64: 16, 32>}, {transform_indices = @transform_4, window_bounds = array<i64: 1, 32>}, {transform_indices = @transform_5, window_bounds = array<i64: 1, 32>}, {transform_indices = @transform_6, window_bounds = array<i64: 16, 32>}]} {
    %c0_i32 = arith.constant 0 : i32
    %0 = arith.cmpi eq, %arg2, %c0_i32 : i32
    %1 = arith.extui %0 : i1 to i32
    %c0_i32_0 = arith.constant 0 : i32
    %2 = arith.cmpi ne, %1, %c0_i32_0 : i32
    scf.if %2 {
      %cst_10 = arith.constant 0.000000e+00 : f32
      %12 = vector.broadcast %cst_10 : f32 to vector<16x32xf32>
      %c0_11 = arith.constant 0 : index
      %c0_12 = arith.constant 0 : index
      %13 = vector.load %arg10[%c0_11, %c0_12] : memref<16x32xf32, #tpu.memory_space<vmem>>, vector<16x32xf32>
      tpu.vector_store %arg10[%c0_11, %c0_12], %12 {strides = array<i32>} : memref<16x32xf32, #tpu.memory_space<vmem>>, vector<16x32xf32>,
    } else {
    }
    %c0 = arith.constant 0 : index
    %c0_1 = arith.constant 0 : index
    %3 = vector.load %arg10[%c0, %c0_1] : memref<16x32xf32, #tpu.memory_space<vmem>>, vector<16x32xf32>
    %c0_2 = arith.constant 0 : index
    %c0_3 = arith.constant 0 : index
    %4 = vector.load %arg3[%c0_2, %c0_3] : memref<16x64xbf16, #tpu.memory_space<vmem>>, vector<16x64xbf16>
    %c0_4 = arith.constant 0 : index
    %c0_5 = arith.constant 0 : index
    %5 = vector.load %arg4[%c0_4, %c0_5] : memref<64x32xbf16, #tpu.memory_space<vmem>>, vector<64x32xbf16>
    %cst = arith.constant dense<0.000000e+00> : vector<16x32xf32>
    %6 = tpu.matmul %4, %5, %cst {dimension_numbers = #tpu.dot_dimension_numbers<[1], [0], [0], [1], [0, 0, 1, 1], [], []>} : vector<16x64xbf16>, vector<64x32xbf16>, vector<16x32xf32> -> vector<16x32xf32>
    %7 = arith.addf %3, %6 : vector<16x32xf32>
    %c0_6 = arith.constant 0 : index
    %c0_7 = arith.constant 0 : index
    %8 = vector.load %arg10[%c0_6, %c0_7] : memref<16x32xf32, #tpu.memory_space<vmem>>, vector<16x32xf32>
    tpu.vector_store %arg10[%c0_6, %c0_7], %7 {strides = array<i32>} : memref<16x32xf32, #tpu.memory_space<vmem>>, vector<16x32xf32>,
    %c0_i32_8 = arith.constant 0 : i32
    %9 = arith.cmpi eq, %arg2, %c0_i32_8 : i32
    %10 = arith.extui %9 : i1 to i32
    %c0_i32_9 = arith.constant 0 : i32
    %11 = arith.cmpi ne, %10, %c0_i32_9 : i32
    scf.if %11 {
      %c0_10 = arith.constant 0 : index
      %c0_11 = arith.constant 0 : index
      %12 = vector.load %arg10[%c0_10, %c0_11] : memref<16x32xf32, #tpu.memory_space<vmem>>, vector<16x32xf32>
      %c0_12 = arith.constant 0 : index
      %c0_13 = arith.constant 0 : index
      %13 = vector.load %arg5[%c0_12, %c0_13] : memref<1x32xf32, #tpu.memory_space<vmem>>, vector<1x32xf32>
      %14 = vector.broadcast %13 : vector<1x32xf32> to vector<16x32xf32>
      %15 = arith.addf %12, %14 : vector<16x32xf32>
      %c0_14 = arith.constant 0 : index
      %c0_15 = arith.constant 0 : index
      %16 = vector.load %arg6[%c0_14, %c0_15] : memref<16x32xbf16, #tpu.memory_space<vmem>>, vector<16x32xbf16>
      %17 = arith.extf %16 : vector<16x32xbf16> to vector<16x32xf32>
      %18 = arith.addf %15, %17 : vector<16x32xf32>
      %cst_16 = arith.constant dense<0.000000e+00> : vector<16xf32>
      %19 = vector.multi_reduction <add>, %18, %cst_16 [1] : vector<16x32xf32> to vector<16xf32>
      %20 = vector.shape_cast %19 : vector<16xf32> to vector<16x1xf32>
      %cst_17 = arith.constant 3.200000e+01 : f32
      %21 = vector.broadcast %cst_17 : f32 to vector<16x1xf32>
      %22 = arith.divf %20, %21 : vector<16x1xf32>
      %23 = vector.broadcast %22 : vector<16x1xf32> to vector<16x32xf32>
      %24 = arith.subf %18, %23 : vector<16x32xf32>
      %25 = vector.broadcast %22 : vector<16x1xf32> to vector<16x32xf32>
      %26 = arith.subf %18, %25 : vector<16x32xf32>
      %27 = arith.mulf %24, %26 : vector<16x32xf32>
      %cst_18 = arith.constant dense<0.000000e+00> : vector<16xf32>
      %28 = vector.multi_reduction <add>, %27, %cst_18 [1] : vector<16x32xf32> to vector<16xf32>
      %29 = vector.shape_cast %28 : vector<16xf32> to vector<16x1xf32>
      %cst_19 = arith.constant 3.200000e+01 : f32
      %30 = vector.broadcast %cst_19 : f32 to vector<16x1xf32>
      %31 = arith.divf %29, %30 : vector<16x1xf32>
      %32 = vector.broadcast %22 : vector<16x1xf32> to vector<16x32xf32>
      %33 = arith.subf %18, %32 : vector<16x32xf32>
      %cst_20 = arith.constant 9.99999996E-13 : f32
      %34 = vector.broadcast %cst_20 : f32 to vector<16x1xf32>
      %35 = arith.addf %31, %34 : vector<16x1xf32>
      %36 = math.rsqrt %35 : vector<16x1xf32>
      %37 = vector.broadcast %36 : vector<16x1xf32> to vector<16x32xf32>
      %38 = arith.mulf %33, %37 : vector<16x32xf32>
      %c0_21 = arith.constant 0 : index
      %c0_22 = arith.constant 0 : index
      %39 = vector.load %arg7[%c0_21, %c0_22] : memref<1x32xf32, #tpu.memory_space<vmem>>, vector<1x32xf32>
      %40 = vector.broadcast %39 : vector<1x32xf32> to vector<16x32xf32>
      %41 = arith.mulf %38, %40 : vector<16x32xf32>
      %c0_23 = arith.constant 0 : index
      %c0_24 = arith.constant 0 : index
      %42 = vector.load %arg8[%c0_23, %c0_24] : memref<1x32xf32, #tpu.memory_space<vmem>>, vector<1x32xf32>
      %43 = vector.broadcast %42 : vector<1x32xf32> to vector<16x32xf32>
      %44 = arith.addf %41, %43 : vector<16x32xf32>
      %45 = arith.truncf %44 : vector<16x32xf32> to vector<16x32xbf16>
      %c0_25 = arith.constant 0 : index
      %c0_26 = arith.constant 0 : index
      %46 = vector.load %arg9[%c0_25, %c0_26] : memref<16x32xbf16, #tpu.memory_space<vmem>>, vector<16x32xbf16>
      tpu.vector_store %arg9[%c0_25, %c0_26], %45 {strides = array<i32>} : memref<16x32xbf16, #tpu.memory_space<vmem>>, vector<16x32xbf16>,
    } else {
    }
    return
  }
  func.func @transform_0(%arg0: i32, %arg1: i32, %arg2: i32) -> (i32, i32) {
    %c0_i32 = arith.constant 0 : i32
    return %arg0, %arg2 : i32, i32
  }
  func.func @transform_1(%arg0: i32, %arg1: i32, %arg2: i32) -> (i32, i32) {
    %c0_i32 = arith.constant 0 : i32
    return %arg2, %arg1 : i32, i32
  }
  func.func @transform_2(%arg0: i32, %arg1: i32, %arg2: i32) -> (i32, i32) {
    %c0_i32 = arith.constant 0 : i32
    %c0_i32_0 = arith.constant 0 : i32
    return %c0_i32, %arg1 : i32, i32
  }
  func.func @transform_3(%arg0: i32, %arg1: i32, %arg2: i32) -> (i32, i32) {
    %c0_i32 = arith.constant 0 : i32
    return %arg0, %arg1 : i32, i32
  }
  func.func @transform_4(%arg0: i32, %arg1: i32, %arg2: i32) -> (i32, i32) {
    %c0_i32 = arith.constant 0 : i32
    %c0_i32_0 = arith.constant 0 : i32
    return %c0_i32, %arg1 : i32, i32
  }
  func.func @transform_5(%arg0: i32, %arg1: i32, %arg2: i32) -> (i32, i32) {
    %c0_i32 = arith.constant 0 : i32
    %c0_i32_0 = arith.constant 0 : i32
    return %c0_i32, %arg1 : i32, i32
  }
  func.func @transform_6(%arg0: i32, %arg1: i32, %arg2: i32) -> (i32, i32) {
    %c0_i32 = arith.constant 0 : i32
    return %arg0, %arg1 : i32, i32
  }
}

module attributes {stable_mosaic.version = 11 : i64} {
  func.func @_fused_linear_kernel(%arg0: i32, %arg1: i32, %arg2: i32, %arg3: memref<16x32xbf16, #tpu.memory_space<vmem>>, %arg4: memref<32x32xbf16, #tpu.memory_space<vmem>>, %arg5: memref<1x32xf32, #tpu.memory_space<vmem>>, %arg6: memref<1x32xf32, #tpu.memory_space<vmem>>, %arg7: memref<1x32xf32, #tpu.memory_space<vmem>>, %arg8: memref<16x32xbf16, #tpu.memory_space<vmem>>, %arg9: memref<16x32xf32, #tpu.memory_space<vmem>>) attributes {dimension_semantics = [#tpu.dimension_semantics<parallel>, #tpu.dimension_semantics<parallel>, #tpu.dimension_semantics<arbitrary>], iteration_bounds = array<i64: 1, 1, 1>, scalar_prefetch = 0 : i64, scratch_operands = 1 : i64, tpu.core_type = #tpu.core_type<tc>, window_params = [{transform_indices = @transform_0, window_bounds = array<i64: 16, 32>}, {transform_indices = @transform_1, window_bounds = array<i64: 32, 32>}, {transform_indices = @transform_2, window_bounds = array<i64: 1, 32>}, {transform_indices = @transform_3, window_bounds = array<i64: 1, 32>}, {transform_indices = @transform_4, window_bounds = array<i64: 1, 32>}, {transform_indices = @transform_5, window_bounds = array<i64: 16, 32>}]} {
    %c0_i32 = arith.constant 0 : i32
    %0 = arith.cmpi eq, %arg2, %c0_i32 : i32
    %1 = arith.extui %0 : i1 to i32
    %c0_i32_0 = arith.constant 0 : i32
    %2 = arith.cmpi ne, %1, %c0_i32_0 : i32
    scf.if %2 {
      %cst_10 = arith.constant 0.000000e+00 : f32
      %12 = vector.broadcast %cst_10 : f32 to vector<16x32xf32>
      %c0_11 = arith.constant 0 : index
      %c0_12 = arith.constant 0 : index
      %13 = vector.load %arg9[%c0_11, %c0_12] : memref<16x32xf32, #tpu.memory_space<vmem>>, vector<16x32xf32>
      tpu.vector_store %arg9[%c0_11, %c0_12], %12 {strides = array<i32>} : memref<16x32xf32, #tpu.memory_space<vmem>>, vector<16x32xf32>,
    } else {
    }
    %c0 = arith.constant 0 : index
    %c0_1 = arith.constant 0 : index
    %3 = vector.load %arg9[%c0, %c0_1] : memref<16x32xf32, #tpu.memory_space<vmem>>, vector<16x32xf32>
    %c0_2 = arith.constant 0 : index
    %c0_3 = arith.constant 0 : index
    %4 = vector.load %arg3[%c0_2, %c0_3] : memref<16x32xbf16, #tpu.memory_space<vmem>>, vector<16x32xbf16>
    %c0_4 = arith.constant 0 : index
    %c0_5 = arith.constant 0 : index
    %5 = vector.load %arg4[%c0_4, %c0_5] : memref<32x32xbf16, #tpu.memory_space<vmem>>, vector<32x32xbf16>
    %cst = arith.constant dense<0.000000e+00> : vector<16x32xf32>
    %6 = tpu.matmul %4, %5, %cst {dimension_numbers = #tpu.dot_dimension_numbers<[1], [0], [0], [1], [0, 0, 1, 1], [], []>} : vector<16x32xbf16>, vector<32x32xbf16>, vector<16x32xf32> -> vector<16x32xf32>
    %7 = arith.addf %3, %6 : vector<16x32xf32>
    %c0_6 = arith.constant 0 : index
    %c0_7 = arith.constant 0 : index
    %8 = vector.load %arg9[%c0_6, %c0_7] : memref<16x32xf32, #tpu.memory_space<vmem>>, vector<16x32xf32>
    tpu.vector_store %arg9[%c0_6, %c0_7], %7 {strides = array<i32>} : memref<16x32xf32, #tpu.memory_space<vmem>>, vector<16x32xf32>,
    %c0_i32_8 = arith.constant 0 : i32
    %9 = arith.cmpi eq, %arg2, %c0_i32_8 : i32
    %10 = arith.extui %9 : i1 to i32
    %c0_i32_9 = arith.constant 0 : i32
    %11 = arith.cmpi ne, %10, %c0_i32_9 : i32
    scf.if %11 {
      %c0_10 = arith.constant 0 : index
      %c0_11 = arith.constant 0 : index
      %12 = vector.load %arg9[%c0_10, %c0_11] : memref<16x32xf32, #tpu.memory_space<vmem>>, vector<16x32xf32>
      %c0_12 = arith.constant 0 : index
      %c0_13 = arith.constant 0 : index
      %13 = vector.load %arg5[%c0_12, %c0_13] : memref<1x32xf32, #tpu.memory_space<vmem>>, vector<1x32xf32>
      %14 = vector.broadcast %13 : vector<1x32xf32> to vector<16x32xf32>
      %15 = arith.addf %12, %14 : vector<16x32xf32>
      %cst_14 = arith.constant 5.000000e-01 : f32
      %16 = vector.broadcast %cst_14 : f32 to vector<16x32xf32>
      %17 = arith.mulf %16, %15 : vector<16x32xf32>
      %cst_15 = arith.constant 0.707106769 : f32
      %18 = vector.broadcast %cst_15 : f32 to vector<16x32xf32>
      %19 = arith.mulf %15, %18 : vector<16x32xf32>
      %20 = math.erf %19 : vector<16x32xf32>
      %cst_16 = arith.constant 1.000000e+00 : f32
      %21 = vector.broadcast %cst_16 : f32 to vector<16x32xf32>
      %22 = arith.addf %21, %20 : vector<16x32xf32>
      %23 = arith.mulf %17, %22 : vector<16x32xf32>
      %cst_17 = arith.constant dense<0.000000e+00> : vector<16xf32>
      %24 = vector.multi_reduction <add>, %23, %cst_17 [1] : vector<16x32xf32> to vector<16xf32>
      %25 = vector.shape_cast %24 : vector<16xf32> to vector<16x1xf32>
      %cst_18 = arith.constant 3.200000e+01 : f32
      %26 = vector.broadcast %cst_18 : f32 to vector<16x1xf32>
      %27 = arith.divf %25, %26 : vector<16x1xf32>
      %28 = vector.broadcast %27 : vector<16x1xf32> to vector<16x32xf32>
      %29 = arith.subf %23, %28 : vector<16x32xf32>
      %30 = vector.broadcast %27 : vector<16x1xf32> to vector<16x32xf32>
      %31 = arith.subf %23, %30 : vector<16x32xf32>
      %32 = arith.mulf %29, %31 : vector<16x32xf32>
      %cst_19 = arith.constant dense<0.000000e+00> : vector<16xf32>
      %33 = vector.multi_reduction <add>, %32, %cst_19 [1] : vector<16x32xf32> to vector<16xf32>
      %34 = vector.shape_cast %33 : vector<16xf32> to vector<16x1xf32>
      %cst_20 = arith.constant 3.200000e+01 : f32
      %35 = vector.broadcast %cst_20 : f32 to vector<16x1xf32>
      %36 = arith.divf %34, %35 : vector<16x1xf32>
      %37 = vector.broadcast %27 : vector<16x1xf32> to vector<16x32xf32>
      %38 = arith.subf %23, %37 : vector<16x32xf32>
      %cst_21 = arith.constant 9.99999974E-6 : f32
      %39 = vector.broadcast %cst_21 : f32 to vector<16x1xf32>
      %40 = arith.addf %36, %39 : vector<16x1xf32>
      %41 = math.rsqrt %40 : vector<16x1xf32>
      %42 = vector.broadcast %41 : vector<16x1xf32> to vector<16x32xf32>
      %43 = arith.mulf %38, %42 : vector<16x32xf32>
      %c0_22 = arith.constant 0 : index
      %c0_23 = arith.constant 0 : index
      %44 = vector.load %arg6[%c0_22, %c0_23] : memref<1x32xf32, #tpu.memory_space<vmem>>, vector<1x32xf32>
      %45 = vector.broadcast %44 : vector<1x32xf32> to vector<16x32xf32>
      %46 = arith.mulf %43, %45 : vector<16x32xf32>
      %c0_24 = arith.constant 0 : index
      %c0_25 = arith.constant 0 : index
      %47 = vector.load %arg7[%c0_24, %c0_25] : memref<1x32xf32, #tpu.memory_space<vmem>>, vector<1x32xf32>
      %48 = vector.broadcast %47 : vector<1x32xf32> to vector<16x32xf32>
      %49 = arith.addf %46, %48 : vector<16x32xf32>
      %50 = arith.truncf %49 : vector<16x32xf32> to vector<16x32xbf16>
      %c0_26 = arith.constant 0 : index
      %c0_27 = arith.constant 0 : index
      %51 = vector.load %arg8[%c0_26, %c0_27] : memref<16x32xbf16, #tpu.memory_space<vmem>>, vector<16x32xbf16>
      tpu.vector_store %arg8[%c0_26, %c0_27], %50 {strides = array<i32>} : memref<16x32xbf16, #tpu.memory_space<vmem>>, vector<16x32xbf16>,
    } else {
    }
    return
  }
  func.func @transform_0(%arg0: i32, %arg1: i32, %arg2: i32) -> (i32, i32) {
    %c0_i32 = arith.constant 0 : i32
    return %arg0, %arg2 : i32, i32
  }
  func.func @transform_1(%arg0: i32, %arg1: i32, %arg2: i32) -> (i32, i32) {
    %c0_i32 = arith.constant 0 : i32
    return %arg2, %arg1 : i32, i32
  }
  func.func @transform_2(%arg0: i32, %arg1: i32, %arg2: i32) -> (i32, i32) {
    %c0_i32 = arith.constant 0 : i32
    %c0_i32_0 = arith.constant 0 : i32
    return %c0_i32, %arg1 : i32, i32
  }
  func.func @transform_3(%arg0: i32, %arg1: i32, %arg2: i32) -> (i32, i32) {
    %c0_i32 = arith.constant 0 : i32
    %c0_i32_0 = arith.constant 0 : i32
    return %c0_i32, %arg1 : i32, i32
  }
  func.func @transform_4(%arg0: i32, %arg1: i32, %arg2: i32) -> (i32, i32) {
    %c0_i32 = arith.constant 0 : i32
    %c0_i32_0 = arith.constant 0 : i32
    return %c0_i32, %arg1 : i32, i32
  }
  func.func @transform_5(%arg0: i32, %arg1: i32, %arg2: i32) -> (i32, i32) {
    %c0_i32 = arith.constant 0 : i32
    return %arg0, %arg1 : i32, i32
  }
}

module attributes {stable_mosaic.version = 11 : i64} {
  func.func @_decoder_ce_kernel(%arg0: i32, %arg1: i32, %arg2: memref<16x32xbf16, #tpu.memory_space<vmem>>, %arg3: memref<32x128xbf16, #tpu.memory_space<vmem>>, %arg4: memref<1x128xf32, #tpu.memory_space<vmem>>, %arg5: memref<16x1xi32, #tpu.memory_space<vmem>>, %arg6: memref<16x1xf32, #tpu.memory_space<vmem>>, %arg7: memref<16x1xf32, #tpu.memory_space<vmem>>, %arg8: memref<16x1xf32, #tpu.memory_space<vmem>>, %arg9: memref<16x1xf32, #tpu.memory_space<vmem>>) attributes {dimension_semantics = [#tpu.dimension_semantics<parallel>, #tpu.dimension_semantics<arbitrary>], iteration_bounds = array<i64: 1, 1>, scalar_prefetch = 0 : i64, scratch_operands = 3 : i64, tpu.core_type = #tpu.core_type<tc>, window_params = [{transform_indices = @transform_0, window_bounds = array<i64: 16, 32>}, {transform_indices = @transform_1, window_bounds = array<i64: 32, 128>}, {transform_indices = @transform_2, window_bounds = array<i64: 1, 128>}, {transform_indices = @transform_3, window_bounds = array<i64: 16, 1>}, {transform_indices = @transform_4, window_bounds = array<i64: 16, 1>}]} {
    %c0_i32 = arith.constant 0 : i32
    %0 = arith.cmpi eq, %arg1, %c0_i32 : i32
    %1 = arith.extui %0 : i1 to i32
    %c0_i32_0 = arith.constant 0 : i32
    %2 = arith.cmpi ne, %1, %c0_i32_0 : i32
    scf.if %2 {
      %cst_28 = arith.constant 0xFF800000 : f32
      %43 = vector.broadcast %cst_28 : f32 to vector<16x1xf32>
      %c0_29 = arith.constant 0 : index
      %c0_30 = arith.constant 0 : index
      %44 = vector.load %arg7[%c0_29, %c0_30] : memref<16x1xf32, #tpu.memory_space<vmem>>, vector<16x1xf32>
      tpu.vector_store %arg7[%c0_29, %c0_30], %43 {strides = array<i32>} : memref<16x1xf32, #tpu.memory_space<vmem>>, vector<16x1xf32>,
      %cst_31 = arith.constant 0.000000e+00 : f32
      %45 = vector.broadcast %cst_31 : f32 to vector<16x1xf32>
      %c0_32 = arith.constant 0 : index
      %c0_33 = arith.constant 0 : index
      %46 = vector.load %arg8[%c0_32, %c0_33] : memref<16x1xf32, #tpu.memory_space<vmem>>, vector<16x1xf32>
      tpu.vector_store %arg8[%c0_32, %c0_33], %45 {strides = array<i32>} : memref<16x1xf32, #tpu.memory_space<vmem>>, vector<16x1xf32>,
      %cst_34 = arith.constant 0.000000e+00 : f32
      %47 = vector.broadcast %cst_34 : f32 to vector<16x1xf32>
      %c0_35 = arith.constant 0 : index
      %c0_36 = arith.constant 0 : index
      %48 = vector.load %arg9[%c0_35, %c0_36] : memref<16x1xf32, #tpu.memory_space<vmem>>, vector<16x1xf32>
      tpu.vector_store %arg9[%c0_35, %c0_36], %47 {strides = array<i32>} : memref<16x1xf32, #tpu.memory_space<vmem>>, vector<16x1xf32>,
    } else {
    }
    %c0 = arith.constant 0 : index
    %c0_1 = arith.constant 0 : index
    %3 = vector.load %arg2[%c0, %c0_1] : memref<16x32xbf16, #tpu.memory_space<vmem>>, vector<16x32xbf16>
    %c0_2 = arith.constant 0 : index
    %c0_3 = arith.constant 0 : index
    %4 = vector.load %arg3[%c0_2, %c0_3] : memref<32x128xbf16, #tpu.memory_space<vmem>>, vector<32x128xbf16>
    %cst = arith.constant dense<0.000000e+00> : vector<16x128xf32>
    %5 = tpu.matmul %3, %4, %cst {dimension_numbers = #tpu.dot_dimension_numbers<[1], [0], [0], [1], [0, 0, 1, 1], [], []>} : vector<16x32xbf16>, vector<32x128xbf16>, vector<16x128xf32> -> vector<16x128xf32>
    %c0_4 = arith.constant 0 : index
    %c0_5 = arith.constant 0 : index
    %6 = vector.load %arg4[%c0_4, %c0_5] : memref<1x128xf32, #tpu.memory_space<vmem>>, vector<1x128xf32>
    %7 = vector.broadcast %6 : vector<1x128xf32> to vector<16x128xf32>
    %8 = arith.addf %5, %7 : vector<16x128xf32>
    %c0_6 = arith.constant 0 : index
    %c0_7 = arith.constant 0 : index
    %9 = vector.load %arg5[%c0_6, %c0_7] : memref<16x1xi32, #tpu.memory_space<vmem>>, vector<16x1xi32>
    %10 = tpu.iota {dimensions = array<i32: 1>} : vector<16x128xi32>
    %c128_i32 = arith.constant 128 : i32
    %11 = arith.muli %arg1, %c128_i32 : i32
    %12 = vector.broadcast %11 : i32 to vector<16x128xi32>
    %13 = arith.addi %10, %12 : vector<16x128xi32>
    %c0_8 = arith.constant 0 : index
    %c0_9 = arith.constant 0 : index
    %14 = vector.load %arg9[%c0_8, %c0_9] : memref<16x1xf32, #tpu.memory_space<vmem>>, vector<16x1xf32>
    %15 = vector.broadcast %9 : vector<16x1xi32> to vector<16x128xi32>
    %16 = arith.cmpi eq, %13, %15 : vector<16x128xi32>
    %cst_10 = arith.constant 0.000000e+00 : f32
    %17 = vector.broadcast %cst_10 : f32 to vector<16x128xf32>
    %18 = arith.select %16, %8, %17 : vector<16x128xi1>, vector<16x128xf32>
    %cst_11 = arith.constant dense<0.000000e+00> : vector<16xf32>
    %19 = vector.multi_reduction <add>, %18, %cst_11 [1] : vector<16x128xf32> to vector<16xf32>
    %20 = vector.shape_cast %19 : vector<16xf32> to vector<16x1xf32>
    %21 = arith.addf %14, %20 : vector<16x1xf32>
    %c0_12 = arith.constant 0 : index
    %c0_13 = arith.constant 0 : index
    %22 = vector.load %arg9[%c0_12, %c0_13] : memref<16x1xf32, #tpu.memory_space<vmem>>, vector<16x1xf32>
    tpu.vector_store %arg9[%c0_12, %c0_13], %21 {strides = array<i32>} : memref<16x1xf32, #tpu.memory_space<vmem>>, vector<16x1xf32>,
    %c0_14 = arith.constant 0 : index
    %c0_15 = arith.constant 0 : index
    %23 = vector.load %arg7[%c0_14, %c0_15] : memref<16x1xf32, #tpu.memory_space<vmem>>, vector<16x1xf32>
    %cst_16 = arith.constant dense<0xFF800000> : vector<16xf32>
    %24 = vector.multi_reduction <maximumf>, %8, %cst_16 [1] : vector<16x128xf32> to vector<16xf32>
    %25 = vector.shape_cast %24 : vector<16xf32> to vector<16x1xf32>
    %26 = arith.maximumf %23, %25 : vector<16x1xf32>
    %c0_17 = arith.constant 0 : index
    %c0_18 = arith.constant 0 : index
    %27 = vector.load %arg8[%c0_17, %c0_18] : memref<16x1xf32, #tpu.memory_space<vmem>>, vector<16x1xf32>
    %c0_19 = arith.constant 0 : index
    %c0_20 = arith.constant 0 : index
    %28 = vector.load %arg7[%c0_19, %c0_20] : memref<16x1xf32, #tpu.memory_space<vmem>>, vector<16x1xf32>
    %29 = arith.subf %28, %26 : vector<16x1xf32>
    %30 = math.exp %29 : vector<16x1xf32>
    %31 = arith.mulf %27, %30 : vector<16x1xf32>
    %32 = vector.broadcast %26 : vector<16x1xf32> to vector<16x128xf32>
    %33 = arith.subf %8, %32 : vector<16x128xf32>
    %34 = math.exp %33 : vector<16x128xf32>
    %cst_21 = arith.constant dense<0.000000e+00> : vector<16xf32>
    %35 = vector.multi_reduction <add>, %34, %cst_21 [1] : vector<16x128xf32> to vector<16xf32>
    %36 = vector.shape_cast %35 : vector<16xf32> to vector<16x1xf32>
    %37 = arith.addf %31, %36 : vector<16x1xf32>
    %c0_22 = arith.constant 0 : index
    %c0_23 = arith.constant 0 : index
    %38 = vector.load %arg8[%c0_22, %c0_23] : memref<16x1xf32, #tpu.memory_space<vmem>>, vector<16x1xf32>
    tpu.vector_store %arg8[%c0_22, %c0_23], %37 {strides = array<i32>} : memref<16x1xf32, #tpu.memory_space<vmem>>, vector<16x1xf32>,
    %c0_24 = arith.constant 0 : index
    %c0_25 = arith.constant 0 : index
    %39 = vector.load %arg7[%c0_24, %c0_25] : memref<16x1xf32, #tpu.memory_space<vmem>>, vector<16x1xf32>
    tpu.vector_store %arg7[%c0_24, %c0_25], %26 {strides = array<i32>} : memref<16x1xf32, #tpu.memory_space<vmem>>, vector<16x1xf32>,
    %c0_i32_26 = arith.constant 0 : i32
    %40 = arith.cmpi eq, %arg1, %c0_i32_26 : i32
    %41 = arith.extui %40 : i1 to i32
    %c0_i32_27 = arith.constant 0 : i32
    %42 = arith.cmpi ne, %41, %c0_i32_27 : i32
    scf.if %42 {
      %c0_28 = arith.constant 0 : index
      %c0_29 = arith.constant 0 : index
      %43 = vector.load %arg7[%c0_28, %c0_29] : memref<16x1xf32, #tpu.memory_space<vmem>>, vector<16x1xf32>
      %c0_30 = arith.constant 0 : index
      %c0_31 = arith.constant 0 : index
      %44 = vector.load %arg8[%c0_30, %c0_31] : memref<16x1xf32, #tpu.memory_space<vmem>>, vector<16x1xf32>
      %45 = math.log %44 : vector<16x1xf32>
      %46 = arith.addf %43, %45 : vector<16x1xf32>
      %c0_32 = arith.constant 0 : index
      %c0_33 = arith.constant 0 : index
      %47 = vector.load %arg9[%c0_32, %c0_33] : memref<16x1xf32, #tpu.memory_space<vmem>>, vector<16x1xf32>
      %48 = arith.subf %46, %47 : vector<16x1xf32>
      %c0_34 = arith.constant 0 : index
      %c0_35 = arith.constant 0 : index
      %49 = vector.load %arg6[%c0_34, %c0_35] : memref<16x1xf32, #tpu.memory_space<vmem>>, vector<16x1xf32>
      tpu.vector_store %arg6[%c0_34, %c0_35], %48 {strides = array<i32>} : memref<16x1xf32, #tpu.memory_space<vmem>>, vector<16x1xf32>,
    } else {
    }
    return
  }
  func.func @transform_0(%arg0: i32, %arg1: i32) -> (i32, i32) {
    %c0_i32 = arith.constant 0 : i32
    %c0_i32_0 = arith.constant 0 : i32
    return %arg0, %c0_i32 : i32, i32
  }
  func.func @transform_1(%arg0: i32, %arg1: i32) -> (i32, i32) {
    %c0_i32 = arith.constant 0 : i32
    %c0_i32_0 = arith.constant 0 : i32
    return %c0_i32, %arg1 : i32, i32
  }
  func.func @transform_2(%arg0: i32, %arg1: i32) -> (i32, i32) {
    %c0_i32 = arith.constant 0 : i32
    %c0_i32_0 = arith.constant 0 : i32
    return %c0_i32, %arg1 : i32, i32
  }
  func.func @transform_3(%arg0: i32, %arg1: i32) -> (i32, i32) {
    %c0_i32 = arith.constant 0 : i32
    %c0_i32_0 = arith.constant 0 : i32
    return %arg0, %c0_i32 : i32, i32
  }
  func.func @transform_4(%arg0: i32, %arg1: i32) -> (i32, i32) {
    %c0_i32 = arith.constant 0 : i32
    %c0_i32_0 = arith.constant 0 : i32
    return %arg0, %c0_i32 : i32, i32
  }
}

</mosaic_0001>

<bundles_post_ra>
// kernel: _lambda_.14
= control target key start
LH: loop header
LB: loop body
LE: loop exit
PB: predicated region body
PF: predicated region fallthrough
CT: control target
= control target key end

     0   :  { %vm19_vm0 = vcmask 785408   ;;  %v151_v0 = vmov 0.0   ;;  %vm152_vm1 = vmmov 0   ;;  %vm47_vm2 = vcmask 261120   ;;  %s195_s1 = inlined_call_operand.vmem [shape: bf16[32,96], index: 1, kind: input, shape index: {}]   ;;  %s196_s0 = inlined_call_operand.vmem [shape: bf16[16,32], index: 0, kind: input, shape index: {}]   ;;  %s197_s2 = inlined_call_operand.vmem [shape: f32[1,96], index: 2, kind: input, shape index: {}]   ;;  %s198_s3 = inlined_call_operand.vmem [shape: bf16[16,96], index: 3, kind: output, shape index: {}]  }
   0x1   :  { %138 = vmatprep.subr.bf16.mxu0 %v151_v0  ;;  %v148_v1 = vld [vmem:[%s195_s1] sm:$0xff]   ;;  %142 = vmatprep.mubr.msk.bf16.mxu0 %vm152_vm1, %v151_v0  ;;  %20 = vst.msk [vmem:[#allocation2] sm:$0xff] %vm19_vm0, %v151_v0  ;;  %21 = vst.msk [vmem:[#allocation2 + $0x8] sm:$0xff] %vm19_vm0, %v151_v0  ;;  %v149_v2 = vld [vmem:[%s195_s1 + $0x8] sm:$0xff]   ;;  %vm119_vm3 = vcmask 781312  }
   0x2   :  { %139 = vmatpush3.bf16.msra.mxu0 %v148_v1  ;;  %v150_v3 = vld [vmem:[%s196_s0] sm:$0xff]  }
   0x3   :  { %140 = vmatprep.subr.bf16.mxu0 %v151_v0  ;;  %v130_v12 = vld [vmem:[%s197_s2] ss:$0 sm:$0xff] }
   0x6   :  { %141 = vmatpush3.bf16.msra.mxu0 %v149_v2 }
   0x8   :  { %v22_v4 = vld [vmem:[#allocation2] sm:$0xff]  ;;  %v23_v6 = vld [vmem:[#allocation2 + $0x8] sm:$0xff] }
   0x9   :  { %143 = vmatmul.mubr.msk.bf16.vlgmr.msra.gmra.mrb[0].mxu0 %vm47_vm2, %v150_v3 }
  0xdc   :  { %v85_v5 = vpop.f32.mrb[0].mxu0 }
  0xdd   :  { %v92_v7 = vadd.f32 %v85_v5, %v22_v4  ;;  %v144_v8 = vpop.f32.mrb[1].mxu0 }
  0xde   :  { %v88_v9 = vpop.f32.mrb[2].mxu0 }
  0xdf   :  { %95 = vst.msk [vmem:[#allocation2] sm:$0xff] %vm19_vm0, %v92_v7  ;;  %v93_v10 = vadd.f32 %v88_v9, %v23_v6  ;;  %v145_v11 = vpop.f32.mrb[3].mxu0 }
  0xe1   :  { %96 = vst.msk [vmem:[#allocation2 + $0x8] sm:$0xff] %vm19_vm0, %v93_v10 }
  0xe6   :  { %v100_v13 = vld [vmem:[#allocation2] sm:$0xff] }
  0xe7   :  { %v109_v14 = vadd.f32 %v130_v12, %v100_v13 }
  0xe8   :  { %v101_v15 = vld [vmem:[#allocation2 + $0x8] sm:$0xff] }
  0xe9   :  { %v133_v16 = vpack.c.bf16 %v109_v14, %v109_v14  ;;  %v110_v17 = vadd.f32 %v130_v12, %v101_v15 }
  0xeb   :  { %120 = vst.msk [vmem:[%s198_s3] sm:$0xf] %vm119_vm3, %v133_v16  ;;  %v134_v18 = vpack.c.bf16 %v110_v17, %v110_v17 }
  0xed   :  { %121 = vst.msk [vmem:[%s198_s3 + $0x4] sm:$0xf] %vm119_vm3, %v134_v18 }

// kernel: _lambda_.13
= control target key start
LH: loop header
LB: loop body
LE: loop exit
PB: predicated region body
PF: predicated region fallthrough
CT: control target
= control target key end

     0   :  { %vm16_vm0 = vcmask 261120   ;;  %vm70_vm1 = vcmask 257024   ;;  %s129_s0 = inlined_call_operand.vmem [shape: f32[16,32], index: 0, kind: input, shape index: {}]   ;;  %s130_s1 = inlined_call_operand.vmem [shape: f32[1,32], index: 1, kind: input, shape index: {}]   ;;  %s131_s2 = inlined_call_operand.vmem [shape: f32[1,32], index: 2, kind: input, shape index: {}]   ;;  %s132_s3 = inlined_call_operand.vmem [shape: bf16[16,32], index: 3, kind: output, shape index: {}]  }
   0x1   :  { %v14_v0 = vld [vmem:[%s129_s0] sm:$0xff]  ;;  %v15_v1 = vld [vmem:[%s129_s0 + $0x8] sm:$0xff] }
   0x2   :  { %v17_v2 = vsel %vm16_vm0, %v14_v0, 0.0  ;;  %v20_v3 = vsel %vm16_vm0, %v15_v1, 0.0  ;;  %v77_v21 = vld [vmem:[%s130_s1] ss:$0 sm:$0xff] }
   0x3   :  { %18 = vadd.xlane.f32.xlu0 %v17_v2  ;;  %v78_v23 = vld [vmem:[%s131_s2] ss:$0 sm:$0xff] }
   0x7   :  { %21 = vadd.xlane.f32.xlu0 %v20_v3 }
  0x90   :  { %v19_v4 = vpop.xlane.xlu0 %18 }
  0x91   :  { %v24_v5 = vmul.f32 0.03125, %v19_v4 }
  0x93   :  { %v26_v6 = vsub.f32 %v14_v0, %v24_v5 }
  0x94   :  { %v22_v7 = vpop.xlane.xlu0 %21 }
  0x95   :  { %v25_v8 = vmul.f32 0.03125, %v22_v7  ;;  %v28_v9 = vmul.f32 %v26_v6, %v26_v6 }
  0x97   :  { %v27_v10 = vsub.f32 %v15_v1, %v25_v8  ;;  %v30_v11 = vsel %vm16_vm0, %v28_v9, 0.0 }
  0x98   :  { %31 = vadd.xlane.f32.xlu1 %v30_v11 }
  0x99   :  { %v29_v12 = vmul.f32 %v27_v10, %v27_v10 }
  0x9b   :  { %v33_v13 = vsel %vm16_vm0, %v29_v12, 0.0 }
  0x9c   :  { %34 = vadd.xlane.f32.xlu1 %v33_v13 }
 0x125   :  { %v32_v14 = vpop.xlane.xlu1 %31 }
 0x126   :  { %v36_v15 = vmul.f32 0.03125, %v32_v14 }
 0x128   :  { %v38_v16 = vadd.f32 1e-12, %v36_v15 }
 0x129   :  { %v35_v17 = vpop.xlane.xlu1 %34 }
 0x12a   :  { %83 = vrsqrt.f32 %v38_v16  ;;  %v37_v18 = vmul.f32 0.03125, %v35_v17 }
 0x12c   :  { %v39_v19 = vadd.f32 1e-12, %v37_v18 }
 0x12e   :  { %85 = vrsqrt.f32 %v39_v19 }
 0x134   :  { %v84_v20 = vpop.eup %83 }
 0x135   :  { %v42_v22 = vmul.f32 %v84_v20, %v26_v6 }
 0x137   :  { %v51_v24 = vmul.f32 %v77_v21, %v42_v22 }
 0x138   :  { %v86_v25 = vpop.eup %85 }
 0x139   :  { %v60_v26 = vadd.f32 %v78_v23, %v51_v24  ;;  %v43_v27 = vmul.f32 %v86_v25, %v27_v10 }
 0x13b   :  { %v81_v28 = vpack.c.bf16 %v60_v26, %v60_v26  ;;  %v52_v29 = vmul.f32 %v77_v21, %v43_v27 }
 0x13d   :  { %71 = vst.msk [vmem:[%s132_s3] sm:$0xf] %vm70_vm1, %v81_v28  ;;  %v61_v30 = vadd.f32 %v78_v23, %v52_v29 }
 0x13f   :  { %v82_v31 = vpack.c.bf16 %v61_v30, %v61_v30 }
 0x141   :  { %72 = vst.msk [vmem:[%s132_s3 + $0x4] sm:$0xf] %vm70_vm1, %v82_v31 }

// kernel: _lambda_.16
= control target key start
LH: loop header
LB: loop body
LE: loop exit
PB: predicated region body
PF: predicated region fallthrough
CT: control target
= control target key end

     0   :  { %vm28_vm0 = vcmask 261120   ;;  %v220_v0 = vmov 0.0   ;;  %vm221_vm1 = vmmov 0   ;;  %vm178_vm2 = vcmask 257024   ;;  %s293_s1 = inlined_call_operand.vmem [shape: bf16[32,32], index: 1, kind: input, shape index: {}]   ;;  %s294_s0 = inlined_call_operand.vmem [shape: bf16[16,32], index: 0, kind: input, shape index: {}]   ;;  %s295_s3 = inlined_call_operand.vmem [shape: bf16[16,32], index: 3, kind: input, shape index: {}]   ;;  %s296_s2 = inlined_call_operand.vmem [shape: f32[1,32], index: 2, kind: input, shape index: {}]   ;;  %s297_s4 = inlined_call_operand.vmem [shape: f32[1,32], index: 4, kind: input, shape index: {}]   ;;  %s298_s5 = inlined_call_operand.vmem [shape: f32[1,32], index: 5, kind: input, shape index: {}]   ;;  %s299_s6 = inlined_call_operand.vmem [shape: bf16[16,32], index: 6, kind: output, shape index: {}]  }
   0x1   :  { %203 = vmatprep.subr.bf16.mxu0 %v220_v0  ;;  %v213_v1 = vld [vmem:[%s293_s1] sm:$0xff]   ;;  %207 = vmatprep.mubr.msk.bf16.mxu0 %vm221_vm1, %v220_v0  ;;  %29 = vst.msk [vmem:[#allocation2] sm:$0xff] %vm28_vm0, %v220_v0  ;;  %30 = vst.msk [vmem:[#allocation2 + $0x8] sm:$0xff] %vm28_vm0, %v220_v0  ;;  %v214_v2 = vld [vmem:[%s293_s1 + $0x8] sm:$0xff]  }
   0x2   :  { %204 = vmatpush3.bf16.msra.mxu0 %v213_v1  ;;  %v215_v3 = vld [vmem:[%s294_s0] sm:$0xff]  }
   0x3   :  { %205 = vmatprep.subr.bf16.mxu0 %v220_v0  ;;  %v197_v12 = vld [vmem:[%s295_s3] sm:$0xff]  }
   0x4   :  { %v189_v13 = vld [vmem:[%s296_s2] ss:$0 sm:$0xff]  ;;  %v198_v14 = vunpack.c.l.bf16 %v197_v12  ;;  %v199_v17 = vunpack.c.h.bf16 %v197_v12 }
   0x5   :  { %v190_v41 = vld [vmem:[%s297_s4] ss:$0 sm:$0xff] }
   0x6   :  { %206 = vmatpush3.bf16.msra.mxu0 %v214_v2  ;;  %v191_v43 = vld [vmem:[%s298_s5] ss:$0 sm:$0xff] }
   0x8   :  { %v31_v4 = vld [vmem:[#allocation2] sm:$0xff]  ;;  %v32_v6 = vld [vmem:[#allocation2 + $0x8] sm:$0xff] }
   0x9   :  { %208 = vmatmul.mubr.msk.bf16.vlgmr.msra.gmra.mrb[0].mxu0 %vm28_vm0, %v215_v3 }
  0xdc   :  { %v94_v5 = vpop.f32.mrb[0].mxu0 }
  0xdd   :  { %v101_v7 = vadd.f32 %v94_v5, %v31_v4  ;;  %v209_v8 = vpop.f32.mrb[1].mxu0 }
  0xde   :  { %v97_v9 = vpop.f32.mrb[2].mxu0 }
  0xdf   :  { %103 = vst.msk [vmem:[#allocation2] sm:$0xff] %vm28_vm0, %v101_v7  ;;  %v102_v10 = vadd.f32 %v97_v9, %v32_v6  ;;  %v210_v11 = vpop.f32.mrb[3].mxu0 }
  0xe1   :  { %104 = vst.msk [vmem:[#allocation2 + $0x8] sm:$0xff] %vm28_vm0, %v102_v10 }
  0xe6   :  { %v108_v15 = vld [vmem:[#allocation2] sm:$0xff] }
  0xe7   :  { %v117_v16 = vadd.f32 %v189_v13, %v108_v15 }
  0xe8   :  { %v109_v18 = vld [vmem:[#allocation2 + $0x8] sm:$0xff] }
  0xe9   :  { %v123_v19 = vadd.f32 %v198_v14, %v117_v16  ;;  %v118_v20 = vadd.f32 %v189_v13, %v109_v18 }
  0xeb   :  { %v125_v21 = vsel %vm28_vm0, %v123_v19, 0.0  ;;  %v124_v22 = vadd.f32 %v199_v17, %v118_v20 }
  0xec   :  { %126 = vadd.xlane.f32.xlu0 %v125_v21 }
  0xed   :  { %v128_v23 = vsel %vm28_vm0, %v124_v22, 0.0 }
  0xf0   :  { %129 = vadd.xlane.f32.xlu0 %v128_v23 }
 0x179   :  { %v127_v24 = vpop.xlane.xlu0 %126 }
 0x17a   :  { %v132_v25 = vmul.f32 0.03125, %v127_v24 }
 0x17c   :  { %v134_v26 = vsub.f32 %v123_v19, %v132_v25 }
 0x17d   :  { %v130_v27 = vpop.xlane.xlu0 %129 }
 0x17e   :  { %v133_v28 = vmul.f32 0.03125, %v130_v27  ;;  %v136_v29 = vmul.f32 %v134_v26, %v134_v26 }
 0x180   :  { %v135_v30 = vsub.f32 %v124_v22, %v133_v28  ;;  %v138_v31 = vsel %vm28_vm0, %v136_v29, 0.0 }
 0x181   :  { %139 = vadd.xlane.f32.xlu1 %v138_v31 }
 0x182   :  { %v137_v32 = vmul.f32 %v135_v30, %v135_v30 }
 0x184   :  { %v141_v33 = vsel %vm28_vm0, %v137_v32, 0.0 }
 0x185   :  { %142 = vadd.xlane.f32.xlu1 %v141_v33 }
 0x20e   :  { %v140_v34 = vpop.xlane.xlu1 %139 }
 0x20f   :  { %v144_v35 = vmul.f32 0.03125, %v140_v34 }
 0x211   :  { %v146_v36 = vadd.f32 1e-12, %v144_v35 }
 0x212   :  { %v143_v37 = vpop.xlane.xlu1 %142 }
 0x213   :  { %216 = vrsqrt.f32 %v146_v36  ;;  %v145_v38 = vmul.f32 0.03125, %v143_v37 }
 0x215   :  { %v147_v39 = vadd.f32 1e-12, %v145_v38 }
 0x217   :  { %218 = vrsqrt.f32 %v147_v39 }
 0x21d   :  { %v217_v40 = vpop.eup %216 }
 0x21e   :  { %v150_v42 = vmul.f32 %v217_v40, %v134_v26 }
 0x220   :  { %v159_v44 = vmul.f32 %v190_v41, %v150_v42 }
 0x221   :  { %v219_v45 = vpop.eup %218 }
 0x222   :  { %v168_v46 = vadd.f32 %v191_v43, %v159_v44  ;;  %v151_v47 = vmul.f32 %v219_v45, %v135_v30 }
 0x224   :  { %v194_v48 = vpack.c.bf16 %v168_v46, %v168_v46  ;;  %v160_v49 = vmul.f32 %v190_v41, %v151_v47 }
 0x226   :  { %179 = vst.msk [vmem:[%s299_s6] sm:$0xf] %vm178_vm2, %v194_v48  ;;  %v169_v50 = vadd.f32 %v191_v43, %v160_v49 }
 0x228   :  { %v195_v51 = vpack.c.bf16 %v169_v50, %v169_v50 }
 0x22a   :  { %180 = vst.msk [vmem:[%s299_s6 + $0x4] sm:$0xf] %vm178_vm2, %v195_v51 }

// kernel: _lambda_.15
= control target key start
LH: loop header
LB: loop body
LE: loop exit
PB: predicated region body
PF: predicated region fallthrough
CT: control target
= control target key end

     0   :  { %s793_s6 = smov 0   ;;  %s879_s0 = inlined_call_operand.vmem [shape: bf16[2,8,96], index: 0, kind: input, shape index: {}]   ;;  %s880_s1 = inlined_call_operand.vmem [shape: bf16[2,8,32], index: 1, kind: output, shape index: {}]  }
   0x1 LB: > { %s635_s7 = sadd.s32 4294967295, %s765_s6   ;;  %p639_p0 = scmp.ge.s32.totalorder %s765_s6, 1  ;;  %s765_s6 = sphi %s793_s6, %s11_s6  }
   0x2   : > { %p86_p1 = scmp.lt.s32.totalorder %s765_s6, 3 }
   0x4   : > { %p87_p2 = pnand %p639_p0, %p86_p1 }
   0x5   : > { %p104_p3 = scmp.lt.s32.totalorder (!%p87_p2), %s635_s7, 1  ;;  %v767_v0 = vmov (!%p87_p2), 0.0   ;;  %vm768_vm0 = vmmov (!%p87_p2), 0   ;;  %s769_s12 = smov (!%p87_p2), 96   ;;  %vm121_vm1 = vcmask (!%p87_p2), 64512   ;;  %vm185_vm2 = vcmask (!%p87_p2), 1043456  }
   0x6   : > { %90 = sbr.rel (%p87_p2) target bundleno = 1598 (0x63e), region = 24  ;;  %670 = vmatprep.subr.bf16.mxu0 (!%p87_p2), %v767_v0  ;;  %672 = vmatprep.mubr.msk.bf16.mxu0 (!%p87_p2), %vm768_vm0, %v767_v0  ;;  %s770_s13 = smov (!%p87_p2), 64   ;;  %vm575_vm3 = vcmask (!%p87_p2), 130048   ;;  %vm577_vm4 = vcmask (!%p87_p2), 195584   ;;  %vm580_vm5 = vcmask (!%p87_p2), 257024  }
   0x7   : > { %676 = vmatprep.subr.bf16.mxu1 (!%p87_p2), %v767_v0  ;;  %678 = vmatprep.mubr.msk.bf16.mxu1 (!%p87_p2), %vm768_vm0, %v767_v0  ;;  %s771_s14 = smov (!%p87_p2), 88   ;;  %s772_s15 = smov (!%p87_p2), 72  }
   0x8   : > { %s773_s16 = smov (!%p87_p2), 120   ;;  %s774_s17 = smov (!%p87_p2), 80  }
   0x9   : > { %s775_s18 = smov (!%p87_p2), 112   ;;  %s776_s19 = smov (!%p87_p2), 104  }
   0xa   : > { %s777_s20 = smov (!%p87_p2), 56   ;;  %s778_s21 = smov (!%p87_p2), 48  }
   0xb   : > { %s779_s22 = smov (!%p87_p2), 40   ;;  %s780_s23 = smov (!%p87_p2), 8  }
   0xc   : > { %s781_s24 = smov (!%p87_p2), 16   ;;  %s782_s25 = smov (!%p87_p2), 24  }
   0xd   : > { %s882_s7 = smov (!%p104_p3, %s635_s7), 1 }
   0xe   : > { %s640_s8 = sshll.u32 %s882_s7, 2 }
   0xf   : > { %s107_s11 = scalar_lea.vmem %s879_s0, %s640_s8  ;;  %s111_s28 = scalar_lea.vmem %s880_s1, %s640_s8 }
  0x10   : > { %v114_v1 = vld [vmem:[%s107_s11] sm:$0xf] }
  0x11   : > { %v815_v2 = vcombine.low %v114_v1, %v114_v1  ;;  %v115_v5 = vmul.bf16 1052065461, %v114_v1 }
  0x13   : > { %119 = vrot.lane.b32.xlu0 %v815_v2, %s769_s12  ;;  %180 = vrot.lane.b32.xlu1 %v815_v2, %s770_s13  ;;  %v645_v18 = vcombine.low %v115_v5, %v115_v5 }
  0x17   : > { %234 = vrot.lane.b32.xlu1 %v815_v2, %s771_s14 }
  0x85   : > { %v120_v3 = vpop.permute.xlu0 %119  ;;  %v181_v11 = vpop.permute.xlu1 %180 }
  0x86   : > { %v126_v4 = vsel %vm121_vm1, %v120_v3, 0  ;;  %v187_v12 = vsel %vm185_vm2, %v181_v11, 0 }
  0x87   : > { %671 = vmatpush3.bf16.xpose.msra.mxu0 %v126_v4  ;;  %677 = vmatpush3.bf16.msra.mxu1 %v187_v12 }
  0x88   : > { %688 = vmatprep.subr.bf16.mxu0 %v767_v0  ;;  %682 = vmatprep.subr.bf16.mxu1 %v767_v0 }
  0x89   : > { %v235_v19 = vpop.permute.xlu1 %234 }
  0x8a   : > { %v240_v25 = vsel %vm121_vm1, %v235_v19, 0 }
  0x8e   : > { %673 = vmatmul.mubr.msk.bf16.vlgmr.msra.gmra.mrb[0].mxu0 %vm121_vm1, %v115_v5 }
  0x8f   : > { %690 = vmatprep.mubr.msk.bf16.mxu0 %vm768_vm0, %v767_v0 }
 0x161   : > { %v162_v6 = vpop.f32.mrb[0].mxu0 }
 0x162   : > { %v674_v7 = vpop.f32.mrb[1].mxu0  ;;  %v168_v8 = vsel %vm121_vm1, %v162_v6, -inf }
 0x163   : > { %169 = vmax.xlane.f32.xlu0 %v168_v8  ;;  %v165_v9 = vpop.f32.mrb[2].mxu0 }
 0x164   : > { %v675_v10 = vpop.f32.mrb[3].mxu0 }
 0x179   : > { %454 = vrot.lane.b32.xlu0 %v815_v2, %s772_s15 }
 0x1f0   : > { %v170_v13 = vpop.xlane.xlu0 %169 }
 0x1f1   : > { %v171_v14 = vsub.f32 %v162_v6, %v170_v13 }
 0x1f3   : > { %v172_v15 = vmul.f32 1.442695, %v171_v14 }
 0x1f4   : > { %v455_v28 = vpop.permute.xlu0 %454 }
 0x1f5   : > { %743 = vpow2.f32 %v172_v15  ;;  %v460_v30 = vsel %vm121_vm1, %v455_v28, 0 }
 0x1ff   : > { %v744_v16 = vpop.eup %743 }
 0x200   : > { %v174_v17 = vsel %vm121_vm1, %v744_v16, 0.0 }
 0x201   : > { %175 = vadd.xlane.f32.xlu1 %v174_v17 }
 0x212   : > { %232 = vrot.lane.b32.xlu1 %v645_v18, %s773_s16 }
 0x216   : > { %344 = vrot.lane.b32.xlu1 %v815_v2, %s774_s17 }
 0x21a   : > { %342 = vrot.lane.b32.xlu1 %v645_v18, %s775_s18 }
 0x21e   : > { %452 = vrot.lane.b32.xlu1 %v645_v18, %s776_s19 }
 0x28e   : > { %v176_v20 = vpop.xlane.xlu1 %175 }
 0x28f   : > { %745 = vrcp.f32 %v176_v20 }
 0x292   : > { %v233_v23 = vpop.permute.xlu1 %232 }
 0x296   : > { %v345_v26 = vpop.permute.xlu1 %344 }
 0x297   : > { %v350_v27 = vsel %vm121_vm1, %v345_v26, 0 }
 0x299   : > { %v746_v21 = vpop.eup %745 }
 0x29a   : > { %v178_v22 = vmul.f32 %v746_v21, %v744_v16  ;;  %v343_v29 = vpop.permute.xlu1 %342 }
 0x29c   : > { %v179_v24 = vpack.c.bf16 %v178_v22, %v178_v22 }
 0x29e   : > { %679 = vmatmul.mubr.msk.bf16.vlgmr.msra.gmra.mrb[0].mxu1 %vm121_vm1, %v179_v24  ;;  %v453_v31 = vpop.permute.xlu1 %452 }
 0x29f   : > { %683 = vmatpush3.bf16.xpose.msra.mxu1 %v240_v25  ;;  %684 = vmatprep.mubr.msk.bf16.mxu1 %vm768_vm0, %v767_v0 }
 0x2a0   : > { %694 = vmatprep.subr.bf16.mxu1 %v767_v0 }
 0x2a6   : > { %685 = vmatmul.mubr.msk.bf16.vlgmr.msra.gmra.mrb[4].mxu1 %vm121_vm1, %v233_v23 }
 0x2a7   : > { %695 = vmatpush3.bf16.xpose.msra.mxu1 %v350_v27  ;;  %696 = vmatprep.mubr.msk.bf16.mxu1 %vm768_vm0, %v767_v0 }
 0x2a8   : > { %706 = vmatprep.subr.bf16.mxu1 %v767_v0 }
 0x2ae   : > { %697 = vmatmul.mubr.msk.bf16.vlgmr.msra.gmra.mrb[8].mxu1 %vm121_vm1, %v343_v29 }
 0x2af   : > { %707 = vmatpush3.bf16.xpose.msra.mxu1 %v460_v30  ;;  %708 = vmatprep.mubr.msk.bf16.mxu1 %vm768_vm0, %v767_v0 }
 0x2b6   : > { %709 = vmatmul.mubr.msk.bf16.vlgmr.msra.gmra.mrb[12].mxu1 %vm121_vm1, %v453_v31 }
 0x371   : > { %v846_v32 = vpop.f32.mrb[0].mxu1 }
 0x372   : > { %v680_v33 = vpop.f32.mrb[1].mxu1 }
 0x373   : > { %v226_v34 = vpop.f32.mrb[2].mxu1 }
 0x374   : > { %v681_v35 = vpop.f32.mrb[3].mxu1 }
 0x379   : > { %v276_v36 = vpop.f32.mrb[4].mxu1 }
 0x37a   : > { %v686_v37 = vpop.f32.mrb[5].mxu1  ;;  %v282_v38 = vsel %vm121_vm1, %v276_v36, -inf }
 0x37b   : > { %283 = vmax.xlane.f32.xlu1 %v282_v38  ;;  %v279_v39 = vpop.f32.mrb[6].mxu1 }
 0x37c   : > { %v687_v40 = vpop.f32.mrb[7].mxu1 }
 0x381   : > { %v386_v41 = vpop.f32.mrb[8].mxu1 }
 0x382   : > { %v392_v42 = vsel %vm121_vm1, %v386_v41, -inf  ;;  %v698_v43 = vpop.f32.mrb[9].mxu1 }
 0x383   : > { %393 = vmax.xlane.f32.xlu0 %v392_v42  ;;  %v389_v44 = vpop.f32.mrb[10].mxu1 }
 0x384   : > { %v699_v45 = vpop.f32.mrb[11].mxu1 }
 0x389   : > { %v496_v46 = vpop.f32.mrb[12].mxu1 }
 0x38a   : > { %v502_v47 = vsel %vm121_vm1, %v496_v46, -inf  ;;  %v710_v48 = vpop.f32.mrb[13].mxu1 }
 0x38b   : > { %503 = vmax.xlane.f32.xlu1 %v502_v47  ;;  %v499_v49 = vpop.f32.mrb[14].mxu1 }
 0x38c   : > { %v711_v50 = vpop.f32.mrb[15].mxu1 }
 0x408   : > { %v284_v51 = vpop.xlane.xlu1 %283 }
 0x409   : > { %v285_v52 = vsub.f32 %v276_v36, %v284_v51 }
 0x40b   : > { %v286_v53 = vmul.f32 1.442695, %v285_v52 }
 0x40d   : > { %747 = vpow2.f32 %v286_v53 }
 0x410   : > { %v394_v61 = vpop.xlane.xlu0 %393 }
 0x411   : > { %v395_v62 = vsub.f32 %v386_v41, %v394_v61 }
 0x413   : > { %v396_v63 = vmul.f32 1.442695, %v395_v62 }
 0x417   : > { %v748_v54 = vpop.eup %747 }
 0x418   : > { %v504_v55 = vpop.xlane.xlu1 %503  ;;  %v288_v56 = vsel %vm121_vm1, %v748_v54, 0.0 }
 0x419   : > { %v505_v57 = vsub.f32 %v496_v46, %v504_v55  ;;  %289 = vadd.xlane.f32.xlu1 %v288_v56 }
 0x41b   : > { %v506_v58 = vmul.f32 1.442695, %v505_v57 }
 0x41d   : > { %749 = vpow2.f32 %v506_v58 }
 0x41e   : > { %751 = vpow2.f32 %v396_v63 }
 0x427   : > { %v750_v59 = vpop.eup %749 }
 0x428   : > { %v508_v60 = vsel %vm121_vm1, %v750_v59, 0.0  ;;  %v752_v1 = vpop.eup %751 }
 0x429   : > { %509 = vadd.xlane.f32.xlu0 %v508_v60  ;;  %v398_v3 = vsel %vm121_vm1, %v752_v1, 0.0 }
 0x42a   : > { %294 = vrot.lane.b32.xlu1 %v815_v2, %s777_s20 }
 0x43f   : > { %404 = vrot.lane.b32.xlu0 %v815_v2, %s778_s21 }
 0x44e   : > { %399 = vadd.xlane.f32.xlu1 %v398_v3 }
 0x45f   : > { %514 = vrot.lane.b32.xlu1 %v815_v2, %s779_s22 }
 0x4a6   : > { %v290_v4 = vpop.xlane.xlu1 %289 }
 0x4a7   : > { %753 = vrcp.f32 %v290_v4 }
 0x4aa   : > { %v295_v5 = vpop.permute.xlu1 %294 }
 0x4ab   : > { %v300_v6 = vsel %vm185_vm2, %v295_v5, 0 }
 0x4ac   : > { %689 = vmatpush3.bf16.msra.mxu0 %v300_v6 }
 0x4ad   : > { %700 = vmatprep.subr.bf16.mxu0 %v767_v0 }
 0x4b1   : > { %v754_v7 = vpop.eup %753 }
 0x4b2   : > { %v292_v8 = vmul.f32 %v754_v7, %v748_v54 }
 0x4b4   : > { %v293_v9 = vpack.c.bf16 %v292_v8, %v292_v8 }
 0x4b6   : > { %691 = vmatmul.mubr.msk.bf16.vlgmr.msra.gmra.mrb[4].mxu0 %vm121_vm1, %v293_v9  ;;  %v510_v10 = vpop.xlane.xlu0 %509 }
 0x4b7   : > { %702 = vmatprep.mubr.msk.bf16.mxu0 %vm768_vm0, %v767_v0 }
 0x4ba   : > { %v405_v11 = vpop.permute.xlu0 %404 }
 0x4bb   : > { %v410_v2 = vsel %vm185_vm2, %v405_v11, 0 }
 0x4bc   : > { %701 = vmatpush3.bf16.msra.mxu0 %v410_v2 }
 0x4bd   : > { %712 = vmatprep.subr.bf16.mxu0 %v767_v0 }
 0x4db   : > { %v400_v12 = vpop.xlane.xlu1 %399 }
 0x4dc   : > { %755 = vrcp.f32 %v400_v12 }
 0x4dd   : > { %757 = vrcp.f32 %v510_v10 }
 0x4df   : > { %v515_v14 = vpop.permute.xlu1 %514 }
 0x4e0   : > { %v520_v16 = vsel %vm185_vm2, %v515_v14, 0 }
 0x4e6   : > { %v756_v13 = vpop.eup %755 }
 0x4e7   : > { %v402_v15 = vmul.f32 %v756_v13, %v752_v1  ;;  %v758_v18 = vpop.eup %757 }
 0x4e8   : > { %v512_v19 = vmul.f32 %v758_v18, %v750_v59 }
 0x4e9   : > { %v403_v17 = vpack.c.bf16 %v402_v15, %v402_v15 }
 0x4ea   : > { %v513_v20 = vpack.c.bf16 %v512_v19, %v512_v19 }
 0x4eb   : > { %703 = vmatmul.mubr.msk.bf16.vlgmr.msra.gmra.mrb[8].mxu0 %vm121_vm1, %v403_v17 }
 0x4ec   : > { %713 = vmatpush3.bf16.msra.mxu0 %v520_v16  ;;  %714 = vmatprep.mubr.msk.bf16.mxu0 %vm768_vm0, %v767_v0 }
 0x4f3   : > { %715 = vmatmul.mubr.msk.bf16.vlgmr.msra.gmra.mrb[12].mxu0 %vm121_vm1, %v513_v20 }
 0x589   : > { %v336_v21 = vpop.f32.mrb[4].mxu0 }
 0x58a   : > { %563 = vrot.lane.b32.xlu1 %v336_v21, %s780_s23  ;;  %v692_v22 = vpop.f32.mrb[5].mxu0 }
 0x58b   : > { %v339_v23 = vpop.f32.mrb[6].mxu0 }
 0x58c   : > { %v693_v24 = vpop.f32.mrb[7].mxu0 }
 0x5be   : > { %v446_v25 = vpop.f32.mrb[8].mxu0 }
 0x5bf   : > { %567 = vrot.lane.b32.xlu0 %v446_v25, %s781_s24  ;;  %v704_v26 = vpop.f32.mrb[9].mxu0 }
 0x5c0   : > { %v449_v27 = vpop.f32.mrb[10].mxu0 }
 0x5c1   : > { %v705_v28 = vpop.f32.mrb[11].mxu0 }
 0x5c6   : > { %v556_v29 = vpop.f32.mrb[12].mxu0 }
 0x5c7   : > { %571 = vrot.lane.b32.xlu1 %v556_v29, %s782_s25  ;;  %v716_v0 = vpop.f32.mrb[13].mxu0 }
 0x5c8   : > { %v559_v30 = vpop.f32.mrb[14].mxu0 }
 0x5c9   : > { %v717_v31 = vpop.f32.mrb[15].mxu0 }
 0x5fc   : > { %v564_v33 = vpop.permute.xlu1 %563 }
 0x5fd   : > { %v574_v35 = vsel %vm121_vm1, %v846_v32, %v564_v33 }
 0x631   : > { %v568_v34 = vpop.permute.xlu0 %567 }
 0x632   : > { %v576_v36 = vsel %vm575_vm3, %v574_v35, %v568_v34 }
 0x639   : > { %v572_v37 = vpop.permute.xlu1 %571 }
 0x63a   : > { %v578_v38 = vsel %vm577_vm4, %v576_v36, %v572_v37 }
 0x63b   : > { %v579_v39 = vpack.c.bf16 %v578_v38, %v578_v38 }
 0x63d   : > { %581 = vst.msk [vmem:[%s111_s28] sm:$0xf] %vm580_vm5, %v579_v39 }
 0x63e PF: > { %s11_s6 = sadd.s32 1, %s765_s6  }
 0x63f   : > { %p8_p4 = scmp.ge.s32.totalorder %s11_s6, 4  }
 0x641   :  { %10 = sbr.rel (!%p8_p4) target bundleno = 1 (0x1), region = 54 }

// kernel: _lambda_.17
= control target key start
LH: loop header
LB: loop body
LE: loop exit
PB: predicated region body
PF: predicated region fallthrough
CT: control target
= control target key end

     0   :  { %vm19_vm0 = vcmask 523264   ;;  %v165_v0 = vmov 0.0   ;;  %vm166_vm1 = vmmov 0   ;;  %vm47_vm2 = vcmask 261120   ;;  %s209_s1 = inlined_call_operand.vmem [shape: bf16[32,64], index: 1, kind: input, shape index: {}]   ;;  %s210_s0 = inlined_call_operand.vmem [shape: bf16[16,32], index: 0, kind: input, shape index: {}]   ;;  %s211_s2 = inlined_call_operand.vmem [shape: f32[1,64], index: 2, kind: input, shape index: {}]   ;;  %s212_s3 = inlined_call_operand.vmem [shape: bf16[16,64], index: 3, kind: output, shape index: {}]  }
   0x1   :  { %148 = vmatprep.subr.bf16.mxu0 %v165_v0  ;;  %v158_v1 = vld [vmem:[%s209_s1] sm:$0xff]   ;;  %152 = vmatprep.mubr.msk.bf16.mxu0 %vm166_vm1, %v165_v0  ;;  %20 = vst.msk [vmem:[#allocation2] sm:$0xff] %vm19_vm0, %v165_v0  ;;  %21 = vst.msk [vmem:[#allocation2 + $0x8] sm:$0xff] %vm19_vm0, %v165_v0  ;;  %v159_v2 = vld [vmem:[%s209_s1 + $0x8] sm:$0xff]   ;;  %vm129_vm3 = vcmask 519168  }
   0x2   :  { %149 = vmatpush3.bf16.msra.mxu0 %v158_v1  ;;  %v160_v3 = vld [vmem:[%s210_s0] sm:$0xff]  }
   0x3   :  { %150 = vmatprep.subr.bf16.mxu0 %v165_v0  ;;  %v140_v12 = vld [vmem:[%s211_s2] ss:$0 sm:$0xff] }
   0x6   :  { %151 = vmatpush3.bf16.msra.mxu0 %v159_v2 }
   0x8   :  { %v22_v4 = vld [vmem:[#allocation2] sm:$0xff]  ;;  %v23_v6 = vld [vmem:[#allocation2 + $0x8] sm:$0xff] }
   0x9   :  { %153 = vmatmul.mubr.msk.bf16.vlgmr.msra.gmra.mrb[0].mxu0 %vm47_vm2, %v160_v3 }
  0xdc   :  { %v85_v5 = vpop.f32.mrb[0].mxu0 }
  0xdd   :  { %v92_v7 = vadd.f32 %v85_v5, %v22_v4  ;;  %v154_v8 = vpop.f32.mrb[1].mxu0 }
  0xde   :  { %v88_v9 = vpop.f32.mrb[2].mxu0 }
  0xdf   :  { %95 = vst.msk [vmem:[#allocation2] sm:$0xff] %vm19_vm0, %v92_v7  ;;  %v93_v10 = vadd.f32 %v88_v9, %v23_v6  ;;  %v155_v11 = vpop.f32.mrb[3].mxu0 }
  0xe1   :  { %96 = vst.msk [vmem:[#allocation2 + $0x8] sm:$0xff] %vm19_vm0, %v93_v10 }
  0xe6   :  { %v100_v13 = vld [vmem:[#allocation2] sm:$0xff] }
  0xe7   :  { %v109_v14 = vadd.f32 %v140_v12, %v100_v13 }
  0xe8   :  { %v101_v15 = vld [vmem:[#allocation2 + $0x8] sm:$0xff] }
  0xe9   :  { %v113_v16 = vmul.f32 0.70710677, %v109_v14  ;;  %v110_v17 = vadd.f32 %v140_v12, %v101_v15  ;;  %v111_v20 = vmul.f32 0.5, %v109_v14 }
  0xeb   :  { %161 = verf.f32 %v113_v16  ;;  %v114_v18 = vmul.f32 0.70710677, %v110_v17  ;;  %v112_v24 = vmul.f32 0.5, %v110_v17 }
  0xed   :  { %163 = verf.f32 %v114_v18 }
  0xf5   :  { %v162_v19 = vpop.eup %161 }
  0xf6   :  { %v117_v21 = vadd.f32 1.0, %v162_v19 }
  0xf7   :  { %v164_v22 = vpop.eup %163 }
  0xf8   :  { %v119_v23 = vmul.f32 %v117_v21, %v111_v20  ;;  %v118_v25 = vadd.f32 1.0, %v164_v22 }
  0xfa   :  { %v143_v26 = vpack.c.bf16 %v119_v23, %v119_v23  ;;  %v120_v27 = vmul.f32 %v118_v25, %v112_v24 }
  0xfc   :  { %130 = vst.msk [vmem:[%s212_s3] sm:$0xf] %vm129_vm3, %v143_v26  ;;  %v144_v28 = vpack.c.bf16 %v120_v27, %v120_v27 }
  0xfe   :  { %131 = vst.msk [vmem:[%s212_s3 + $0x4] sm:$0xf] %vm129_vm3, %v144_v28 }

// kernel: _lambda_.18
= control target key start
LH: loop header
LB: loop body
LE: loop exit
PB: predicated region body
PF: predicated region fallthrough
CT: control target
= control target key end

     0   :  { %vm28_vm0 = vcmask 261120   ;;  %v247_v0 = vmov 0.0   ;;  %vm248_vm1 = vmmov 0   ;;  %vm72_vm2 = vcmask 523264   ;;  %s325_s1 = inlined_call_operand.vmem [shape: bf16[64,32], index: 1, kind: input, shape index: {}]   ;;  %s326_s0 = inlined_call_operand.vmem [shape: bf16[16,64], index: 0, kind: input, shape index: {}]   ;;  %s327_s3 = inlined_call_operand.vmem [shape: bf16[16,32], index: 3, kind: input, shape index: {}]   ;;  %s328_s2 = inlined_call_operand.vmem [shape: f32[1,32], index: 2, kind: input, shape index: {}]   ;;  %s329_s4 = inlined_call_operand.vmem [shape: f32[1,32], index: 4, kind: input, shape index: {}]   ;;  %s330_s5 = inlined_call_operand.vmem [shape: f32[1,32], index: 5, kind: input, shape index: {}]   ;;  %s331_s6 = inlined_call_operand.vmem [shape: bf16[16,32], index: 6, kind: output, shape index: {}]  }
   0x1   :  { %224 = vmatprep.subr.bf16.mxu0 %v247_v0  ;;  %v238_v1 = vld [vmem:[%s325_s1] sm:$0xff]   ;;  %232 = vmatprep.mubr.msk.bf16.mxu0 %vm248_vm1, %v247_v0  ;;  %29 = vst.msk [vmem:[#allocation2] sm:$0xff] %vm28_vm0, %v247_v0  ;;  %30 = vst.msk [vmem:[#allocation2 + $0x8] sm:$0xff] %vm28_vm0, %v247_v0  ;;  %v239_v2 = vld [vmem:[%s325_s1 + $0x8] sm:$0xff]   ;;  %vm195_vm3 = vcmask 257024  }
   0x2   :  { %225 = vmatpush3.bf16.msra.mxu0 %v238_v1  ;;  %v240_v3 = vld [vmem:[%s325_s1 + $0x10] sm:$0xff]   ;;  %v241_v4 = vld [vmem:[%s325_s1 + $0x18] sm:$0xff]   ;;  %v242_v5 = vld [vmem:[%s326_s0] sm:$0xff]  }
   0x3   :  { %226 = vmatprep.subr.bf16.mxu0 %v247_v0  ;;  %v216_v14 = vld [vmem:[%s327_s3] sm:$0xff]  }
   0x4   :  { %v208_v15 = vld [vmem:[%s328_s2] ss:$0 sm:$0xff]  ;;  %v217_v16 = vunpack.c.l.bf16 %v216_v14  ;;  %v218_v19 = vunpack.c.h.bf16 %v216_v14 }
   0x5   :  { %v209_v43 = vld [vmem:[%s329_s4] ss:$0 sm:$0xff] }
   0x6   :  { %227 = vmatpush3.bf16.msra.mxu0 %v239_v2  ;;  %v210_v45 = vld [vmem:[%s330_s5] ss:$0 sm:$0xff] }
   0x7   :  { %228 = vmatprep.subr.bf16.mxu0 %v247_v0 }
   0x8   :  { %v31_v6 = vld [vmem:[#allocation2] sm:$0xff]  ;;  %v32_v8 = vld [vmem:[#allocation2 + $0x8] sm:$0xff] }
   0xa   :  { %229 = vmatpush3.bf16.msra.mxu0 %v240_v3 }
   0xb   :  { %230 = vmatprep.subr.bf16.mxu0 %v247_v0 }
   0xe   :  { %231 = vmatpush3.bf16.msra.mxu0 %v241_v4 }
  0x11   :  { %233 = vmatmul.mubr.msk.bf16.vlgmr.msra.gmra.mrb[0].mxu0 %vm72_vm2, %v242_v5 }
  0xe4   :  { %v110_v7 = vpop.f32.mrb[0].mxu0 }
  0xe5   :  { %v117_v9 = vadd.f32 %v110_v7, %v31_v6  ;;  %v234_v10 = vpop.f32.mrb[1].mxu0 }
  0xe6   :  { %v113_v11 = vpop.f32.mrb[2].mxu0 }
  0xe7   :  { %120 = vst.msk [vmem:[#allocation2] sm:$0xff] %vm28_vm0, %v117_v9  ;;  %v118_v12 = vadd.f32 %v113_v11, %v32_v8  ;;  %v235_v13 = vpop.f32.mrb[3].mxu0 }
  0xe9   :  { %121 = vst.msk [vmem:[#allocation2 + $0x8] sm:$0xff] %vm28_vm0, %v118_v12 }
  0xee   :  { %v125_v17 = vld [vmem:[#allocation2] sm:$0xff] }
  0xef   :  { %v134_v18 = vadd.f32 %v208_v15, %v125_v17 }
  0xf0   :  { %v126_v20 = vld [vmem:[#allocation2 + $0x8] sm:$0xff] }
  0xf1   :  { %v140_v21 = vadd.f32 %v217_v16, %v134_v18  ;;  %v135_v22 = vadd.f32 %v208_v15, %v126_v20 }
  0xf3   :  { %v142_v23 = vsel %vm28_vm0, %v140_v21, 0.0  ;;  %v141_v24 = vadd.f32 %v218_v19, %v135_v22 }
  0xf4   :  { %143 = vadd.xlane.f32.xlu0 %v142_v23 }
  0xf5   :  { %v145_v25 = vsel %vm28_vm0, %v141_v24, 0.0 }
  0xf8   :  { %146 = vadd.xlane.f32.xlu0 %v145_v25 }
 0x181   :  { %v144_v26 = vpop.xlane.xlu0 %143 }
 0x182   :  { %v149_v27 = vmul.f32 0.03125, %v144_v26 }
 0x184   :  { %v151_v28 = vsub.f32 %v140_v21, %v149_v27 }
 0x185   :  { %v147_v29 = vpop.xlane.xlu0 %146 }
 0x186   :  { %v150_v30 = vmul.f32 0.03125, %v147_v29  ;;  %v153_v31 = vmul.f32 %v151_v28, %v151_v28 }
 0x188   :  { %v152_v32 = vsub.f32 %v141_v24, %v150_v30  ;;  %v155_v33 = vsel %vm28_vm0, %v153_v31, 0.0 }
 0x189   :  { %156 = vadd.xlane.f32.xlu1 %v155_v33 }
 0x18a   :  { %v154_v34 = vmul.f32 %v152_v32, %v152_v32 }
 0x18c   :  { %v158_v35 = vsel %vm28_vm0, %v154_v34, 0.0 }
 0x18d   :  { %159 = vadd.xlane.f32.xlu1 %v158_v35 }
 0x216   :  { %v157_v36 = vpop.xlane.xlu1 %156 }
 0x217   :  { %v161_v37 = vmul.f32 0.03125, %v157_v36 }
 0x219   :  { %v163_v38 = vadd.f32 1e-12, %v161_v37 }
 0x21a   :  { %v160_v39 = vpop.xlane.xlu1 %159 }
 0x21b   :  { %243 = vrsqrt.f32 %v163_v38  ;;  %v162_v40 = vmul.f32 0.03125, %v160_v39 }
 0x21d   :  { %v164_v41 = vadd.f32 1e-12, %v162_v40 }
 0x21f   :  { %245 = vrsqrt.f32 %v164_v41 }
 0x225   :  { %v244_v42 = vpop.eup %243 }
 0x226   :  { %v167_v44 = vmul.f32 %v244_v42, %v151_v28 }
 0x228   :  { %v176_v46 = vmul.f32 %v209_v43, %v167_v44 }
 0x229   :  { %v246_v47 = vpop.eup %245 }
 0x22a   :  { %v185_v48 = vadd.f32 %v210_v45, %v176_v46  ;;  %v168_v49 = vmul.f32 %v246_v47, %v152_v32 }
 0x22c   :  { %v213_v50 = vpack.c.bf16 %v185_v48, %v185_v48  ;;  %v177_v51 = vmul.f32 %v209_v43, %v168_v49 }
 0x22e   :  { %196 = vst.msk [vmem:[%s331_s6] sm:$0xf] %vm195_vm3, %v213_v50  ;;  %v186_v52 = vadd.f32 %v210_v45, %v177_v51 }
 0x230   :  { %v214_v53 = vpack.c.bf16 %v186_v52, %v186_v52 }
 0x232   :  { %197 = vst.msk [vmem:[%s331_s6 + $0x4] sm:$0xf] %vm195_vm3, %v214_v53 }

// kernel: _lambda_.24
= control target key start
LH: loop header
LB: loop body
LE: loop exit
PB: predicated region body
PF: predicated region fallthrough
CT: control target
= control target key end

     0   :  { %vm25_vm0 = vcmask 261120   ;;  %v221_v0 = vmov 0.0   ;;  %vm222_vm1 = vmmov 0   ;;  %vm179_vm2 = vcmask 257024   ;;  %s286_s1 = inlined_call_operand.vmem [shape: bf16[32,32], index: 1, kind: input, shape index: {}]   ;;  %s287_s0 = inlined_call_operand.vmem [shape: bf16[16,32], index: 0, kind: input, shape index: {}]   ;;  %s288_s2 = inlined_call_operand.vmem [shape: f32[1,32], index: 2, kind: input, shape index: {}]   ;;  %s289_s3 = inlined_call_operand.vmem [shape: f32[1,32], index: 3, kind: input, shape index: {}]   ;;  %s290_s4 = inlined_call_operand.vmem [shape: f32[1,32], index: 4, kind: input, shape index: {}]   ;;  %s291_s5 = inlined_call_operand.vmem [shape: bf16[16,32], index: 5, kind: output, shape index: {}]  }
   0x1   :  { %200 = vmatprep.subr.bf16.mxu0 %v221_v0  ;;  %v210_v1 = vld [vmem:[%s286_s1] sm:$0xff]   ;;  %204 = vmatprep.mubr.msk.bf16.mxu0 %vm222_vm1, %v221_v0  ;;  %26 = vst.msk [vmem:[#allocation2] sm:$0xff] %vm25_vm0, %v221_v0  ;;  %27 = vst.msk [vmem:[#allocation2 + $0x8] sm:$0xff] %vm25_vm0, %v221_v0  ;;  %v211_v2 = vld [vmem:[%s286_s1 + $0x8] sm:$0xff]  }
   0x2   :  { %201 = vmatpush3.bf16.msra.mxu0 %v210_v1  ;;  %v212_v3 = vld [vmem:[%s287_s0] sm:$0xff]  }
   0x3   :  { %202 = vmatprep.subr.bf16.mxu0 %v221_v0  ;;  %v190_v12 = vld [vmem:[%s288_s2] ss:$0 sm:$0xff] }
   0x4   :  { %v191_v46 = vld [vmem:[%s289_s3] ss:$0 sm:$0xff] }
   0x5   :  { %v192_v48 = vld [vmem:[%s290_s4] ss:$0 sm:$0xff] }
   0x6   :  { %203 = vmatpush3.bf16.msra.mxu0 %v211_v2 }
   0x8   :  { %v28_v4 = vld [vmem:[#allocation2] sm:$0xff]  ;;  %v29_v6 = vld [vmem:[#allocation2 + $0x8] sm:$0xff] }
   0x9   :  { %205 = vmatmul.mubr.msk.bf16.vlgmr.msra.gmra.mrb[0].mxu0 %vm25_vm0, %v212_v3 }
  0xdc   :  { %v91_v5 = vpop.f32.mrb[0].mxu0 }
  0xdd   :  { %v98_v7 = vadd.f32 %v91_v5, %v28_v4  ;;  %v206_v8 = vpop.f32.mrb[1].mxu0 }
  0xde   :  { %v94_v9 = vpop.f32.mrb[2].mxu0 }
  0xdf   :  { %100 = vst.msk [vmem:[#allocation2] sm:$0xff] %vm25_vm0, %v98_v7  ;;  %v99_v10 = vadd.f32 %v94_v9, %v29_v6  ;;  %v207_v11 = vpop.f32.mrb[3].mxu0 }
  0xe1   :  { %101 = vst.msk [vmem:[#allocation2 + $0x8] sm:$0xff] %vm25_vm0, %v99_v10 }
  0xe6   :  { %v105_v13 = vld [vmem:[#allocation2] sm:$0xff] }
  0xe7   :  { %v114_v14 = vadd.f32 %v190_v12, %v105_v13 }
  0xe8   :  { %v106_v15 = vld [vmem:[#allocation2 + $0x8] sm:$0xff] }
  0xe9   :  { %v118_v16 = vmul.f32 0.70710677, %v114_v14  ;;  %v115_v17 = vadd.f32 %v190_v12, %v106_v15  ;;  %v116_v20 = vmul.f32 0.5, %v114_v14 }
  0xeb   :  { %213 = verf.f32 %v118_v16  ;;  %v119_v18 = vmul.f32 0.70710677, %v115_v17  ;;  %v117_v24 = vmul.f32 0.5, %v115_v17 }
  0xed   :  { %215 = verf.f32 %v119_v18 }
  0xf5   :  { %v214_v19 = vpop.eup %213 }
  0xf6   :  { %v122_v21 = vadd.f32 1.0, %v214_v19 }
  0xf7   :  { %v216_v22 = vpop.eup %215 }
  0xf8   :  { %v124_v23 = vmul.f32 %v122_v21, %v116_v20  ;;  %v123_v25 = vadd.f32 1.0, %v216_v22 }
  0xfa   :  { %v126_v26 = vsel %vm25_vm0, %v124_v23, 0.0  ;;  %v125_v27 = vmul.f32 %v123_v25, %v117_v24 }
  0xfb   :  { %127 = vadd.xlane.f32.xlu0 %v126_v26 }
  0xfc   :  { %v129_v28 = vsel %vm25_vm0, %v125_v27, 0.0 }
  0xff   :  { %130 = vadd.xlane.f32.xlu0 %v129_v28 }
 0x188   :  { %v128_v29 = vpop.xlane.xlu0 %127 }
 0x189   :  { %v133_v30 = vmul.f32 0.03125, %v128_v29 }
 0x18b   :  { %v135_v31 = vsub.f32 %v124_v23, %v133_v30 }
 0x18c   :  { %v131_v32 = vpop.xlane.xlu0 %130 }
 0x18d   :  { %v134_v33 = vmul.f32 0.03125, %v131_v32  ;;  %v137_v34 = vmul.f32 %v135_v31, %v135_v31 }
 0x18f   :  { %v136_v35 = vsub.f32 %v125_v27, %v134_v33  ;;  %v139_v36 = vsel %vm25_vm0, %v137_v34, 0.0 }
 0x190   :  { %140 = vadd.xlane.f32.xlu1 %v139_v36 }
 0x191   :  { %v138_v37 = vmul.f32 %v136_v35, %v136_v35 }
 0x193   :  { %v142_v38 = vsel %vm25_vm0, %v138_v37, 0.0 }
 0x194   :  { %143 = vadd.xlane.f32.xlu1 %v142_v38 }
 0x21d   :  { %v141_v39 = vpop.xlane.xlu1 %140 }
 0x21e   :  { %v145_v40 = vmul.f32 0.03125, %v141_v39 }
 0x220   :  { %v147_v41 = vadd.f32 1e-05, %v145_v40 }
 0x221   :  { %v144_v42 = vpop.xlane.xlu1 %143 }
 0x222   :  { %217 = vrsqrt.f32 %v147_v41  ;;  %v146_v43 = vmul.f32 0.03125, %v144_v42 }
 0x224   :  { %v148_v44 = vadd.f32 1e-05, %v146_v43 }
 0x226   :  { %219 = vrsqrt.f32 %v148_v44 }
 0x22c   :  { %v218_v45 = vpop.eup %217 }
 0x22d   :  { %v151_v47 = vmul.f32 %v218_v45, %v135_v31 }
 0x22f   :  { %v160_v49 = vmul.f32 %v191_v46, %v151_v47 }
 0x230   :  { %v220_v50 = vpop.eup %219 }
 0x231   :  { %v169_v51 = vadd.f32 %v192_v48, %v160_v49  ;;  %v152_v52 = vmul.f32 %v220_v50, %v136_v35 }
 0x233   :  { %v195_v53 = vpack.c.bf16 %v169_v51, %v169_v51  ;;  %v161_v54 = vmul.f32 %v191_v46, %v152_v52 }
 0x235   :  { %180 = vst.msk [vmem:[%s291_s5] sm:$0xf] %vm179_vm2, %v195_v53  ;;  %v170_v55 = vadd.f32 %v192_v48, %v161_v54 }
 0x237   :  { %v196_v56 = vpack.c.bf16 %v170_v55, %v170_v55 }
 0x239   :  { %181 = vst.msk [vmem:[%s291_s5 + $0x4] sm:$0xf] %vm179_vm2, %v196_v56 }

// kernel: _lambda_.25
= control target key start
LH: loop header
LB: loop body
LE: loop exit
PB: predicated region body
PF: predicated region fallthrough
CT: control target
= control target key end

     0   :  { %v236_v0 = vmov 0.0   ;;  %vm237_vm0 = vmmov 0   ;;  %vm59_vm1 = vcmask 261120   ;;  %v238_v4 = vmov 0   ;;  %s303_s1 = inlined_call_operand.vmem [shape: bf16[32,128], index: 1, kind: input, shape index: {}]   ;;  %s304_s0 = inlined_call_operand.vmem [shape: bf16[16,32], index: 0, kind: input, shape index: {}]   ;;  %s305_s2 = inlined_call_operand.vmem [shape: f32[1,128], index: 2, kind: input, shape index: {}]   ;;  %s306_s3 = inlined_call_operand.vmem [shape: s32[16,1], index: 3, kind: input, shape index: {}]   ;;  %s307_s4 = inlined_call_operand.vmem [shape: f32[16,1], index: 4, kind: output, shape index: {}]  }
   0x1   :  { %207 = vmatprep.subr.bf16.mxu0 %v236_v0  ;;  %v221_v1 = vld [vmem:[%s303_s1] sm:$0xff]   ;;  %211 = vmatprep.mubr.msk.bf16.mxu0 %vm237_vm0, %v236_v0  ;;  %v222_v2 = vld [vmem:[%s303_s1 + $0x8] sm:$0xff]   ;;  %vm22_vm2 = vcmask 7168   ;;  %v239_v5 = vmov -inf   ;;  %v106_v21 = vlaneseq }
   0x2   :  { %208 = vmatpush3.bf16.msra.mxu0 %v221_v1  ;;  %v223_v3 = vld [vmem:[%s304_s0] sm:$0xff]   ;;  %220 = vset.pattern.permute.xlu0 %v238_v4  ;;  %23 = vst.msk [vmem:[#allocation2] sm:$0xff] %vm22_vm2, %v239_v5  ;;  %24 = vst.msk [vmem:[#allocation2 + $0x8] sm:$0xff] %vm22_vm2, %v239_v5  ;;  %v105_v23 = vld [vmem:[%s306_s3 + $0x8] sm:$0xff] }
   0x3   :  { %209 = vmatprep.subr.bf16.mxu0 %v236_v0  ;;  %219 = vset.pattern.permute.xlu1 %v238_v4  ;;  %25 = vst.msk [vmem:[#allocation3] sm:$0xff] %vm22_vm2, %v236_v0  ;;  %26 = vst.msk [vmem:[#allocation3 + $0x8] sm:$0xff] %vm22_vm2, %v236_v0  ;;  %v199_v6 = vld [vmem:[%s305_s2] ss:$0 sm:$0xff]  ;;  %v107_v24 = vand.u32 127, %v106_v21 }
   0x4   :  { %27 = vst.msk [vmem:[#allocation4] sm:$0xff] %vm22_vm2, %v236_v0  ;;  %28 = vst.msk [vmem:[#allocation4 + $0x8] sm:$0xff] %vm22_vm2, %v236_v0  ;;  %v104_v13 = vld [vmem:[%s306_s3] sm:$0xff] }
   0x6   :  { %210 = vmatpush3.bf16.msra.mxu0 %v222_v2 }
   0x9   :  { %212 = vmatmul.mubr.msk.bf16.vlgmr.msra.gmra.mrb[0].mxu0 %vm59_vm1, %v223_v3  ;;  %v132_v14 = vld [vmem:[#allocation2] sm:$0xff]  ;;  %v133_v17 = vld [vmem:[#allocation2 + $0x8] sm:$0xff] }
   0xa   :  { %v140_v43 = vld [vmem:[#allocation3] sm:$0xff]  ;;  %v141_v47 = vld [vmem:[#allocation3 + $0x8] sm:$0xff] }
   0xb   :  { %v111_v37 = vld [vmem:[#allocation4] sm:$0xff]  ;;  %v112_v52 = vld [vmem:[#allocation4 + $0x8] sm:$0xff] }
  0xdc   :  { %v97_v7 = vpop.f32.mrb[0].mxu0 }
  0xdd   :  { %v98_v8 = vadd.f32 %v199_v6, %v97_v7  ;;  %v213_v9 = vpop.f32.mrb[1].mxu0 }
  0xde   :  { %v100_v10 = vpop.f32.mrb[2].mxu0 }
  0xdf   :  { %134 = vmax.xlane.f32.xlu0 %v98_v8  ;;  %v214_v11 = vpop.f32.mrb[3].mxu0  ;;  %v101_v12 = vadd.f32 %v199_v6, %v100_v10 }
  0xe3   :  { %136 = vmax.xlane.f32.xlu0 %v101_v12 }
  0xf9   :  { %114 = vperm.xlu0 %220, %v104_v13  }
 0x16c   :  { %v135_v15 = vpop.xlane.xlu0 %134 }
 0x16d   :  { %v138_v16 = vmax.f32 %v132_v14, %v135_v15 }
 0x16f   :  { %v142_v18 = vsub.f32 %v132_v14, %v138_v16  ;;  %174 = vst.msk [vmem:[#allocation2] sm:$0xff] %vm22_vm2, %v138_v16  ;;  %152 = vperm.xlu1 %219, %v138_v16  }
 0x170   :  { %v137_v19 = vpop.xlane.xlu0 %136 }
 0x171   :  { %v139_v20 = vmax.f32 %v133_v17, %v137_v19  ;;  %v144_v40 = vmul.f32 1.442695, %v142_v18 }
 0x173   :  { %v143_v22 = vsub.f32 %v133_v17, %v139_v20  ;;  %175 = vst.msk [vmem:[#allocation2 + $0x8] sm:$0xff] %vm22_vm2, %v139_v20  ;;  %157 = vperm.xlu1 %219, %v139_v20  }
 0x175   :  { %v146_v41 = vmul.f32 1.442695, %v143_v22 }
 0x176   :  { %v179_v59 = vld [vmem:[#allocation2] sm:$0xff] }
 0x177   :  { %117 = vperm.xlu1 %219, %v105_v23  }
 0x178   :  { %v115_v25 = vpop.permute.xlu0 %114 }
 0x179   :  { %vm119_vm3 = vcmp.eq.s32.totalorder %v107_v24, %v115_v25 }
 0x17a   :  { %v121_v26 = vsel %vm119_vm3, %v98_v8, 0.0  ;;  %v180_v1 = vld [vmem:[#allocation2 + $0x8] sm:$0xff] }
 0x17b   :  { %123 = vadd.xlane.f32.xlu0 %v121_v26 }
 0x1ee   :  { %v153_v27 = vpop.permute.xlu1 %152 }
 0x1ef   :  { %v160_v28 = vsub.f32 %v98_v8, %v153_v27 }
 0x1f1   :  { %v162_v29 = vmul.f32 1.442695, %v160_v28 }
 0x1f2   :  { %v158_v30 = vpop.permute.xlu1 %157 }
 0x1f3   :  { %224 = vpow2.f32 %v162_v29  ;;  %v161_v31 = vsub.f32 %v101_v12, %v158_v30 }
 0x1f5   :  { %v164_v32 = vmul.f32 1.442695, %v161_v31 }
 0x1f6   :  { %v118_v34 = vpop.permute.xlu1 %117 }
 0x1f7   :  { %226 = vpow2.f32 %v164_v32  ;;  %vm120_vm4 = vcmp.eq.s32.totalorder %v107_v24, %v118_v34 }
 0x1f8   :  { %v122_v36 = vsel %vm120_vm4, %v101_v12, 0.0  ;;  %228 = vpow2.f32 %v144_v40 }
 0x1f9   :  { %230 = vpow2.f32 %v146_v41 }
 0x1fd   :  { %v225_v33 = vpop.eup %224 }
 0x1fe   :  { %166 = vadd.xlane.f32.xlu1 %v225_v33 }
 0x201   :  { %v227_v35 = vpop.eup %226 }
 0x202   :  { %168 = vadd.xlane.f32.xlu1 %v227_v35  ;;  %v229_v42 = vpop.eup %228 }
 0x203   :  { %v148_v44 = vmul.f32 %v229_v42, %v140_v43  ;;  %v231_v45 = vpop.eup %230 }
 0x204   :  { %v149_v49 = vmul.f32 %v231_v45, %v141_v47 }
 0x206   :  { %125 = vadd.xlane.f32.xlu1 %v122_v36 }
 0x208   :  { %v124_v38 = vpop.xlane.xlu0 %123 }
 0x209   :  { %v127_v39 = vadd.f32 %v124_v38, %v111_v37 }
 0x20b   :  { %130 = vst.msk [vmem:[#allocation4] sm:$0xff] %vm22_vm2, %v127_v39 }
 0x212   :  { %v189_v62 = vld [vmem:[#allocation4] sm:$0xff] }
 0x28b   :  { %v167_v46 = vpop.xlane.xlu1 %166 }
 0x28c   :  { %v170_v48 = vadd.f32 %v167_v46, %v148_v44 }
 0x28e   :  { %172 = vst.msk [vmem:[#allocation3] sm:$0xff] %vm22_vm2, %v170_v48 }
 0x28f   :  { %v169_v50 = vpop.xlane.xlu1 %168 }
 0x290   :  { %v171_v51 = vadd.f32 %v169_v50, %v149_v49 }
 0x292   :  { %173 = vst.msk [vmem:[#allocation3 + $0x8] sm:$0xff] %vm22_vm2, %v171_v51 }
 0x293   :  { %v126_v53 = vpop.xlane.xlu1 %125 }
 0x294   :  { %v128_v54 = vadd.f32 %v126_v53, %v112_v52 }
 0x295   :  { %v181_v55 = vld [vmem:[#allocation3] sm:$0xff] }
 0x296   :  { %232 = vlog2.f32 %v181_v55  ;;  %131 = vst.msk [vmem:[#allocation4 + $0x8] sm:$0xff] %vm22_vm2, %v128_v54 }
 0x299   :  { %v182_v56 = vld [vmem:[#allocation3 + $0x8] sm:$0xff] }
 0x29a   :  { %234 = vlog2.f32 %v182_v56 }
 0x29d   :  { %v190_v3 = vld [vmem:[#allocation4 + $0x8] sm:$0xff] }
 0x2a0   :  { %v233_v57 = vpop.eup %232 }
 0x2a1   :  { %v184_v58 = vmul.f32 0.6931472, %v233_v57 }
 0x2a3   :  { %v187_v60 = vadd.f32 %v184_v58, %v179_v59 }
 0x2a4   :  { %v235_v61 = vpop.eup %234 }
 0x2a5   :  { %v191_v63 = vsub.f32 %v187_v60, %v189_v62  ;;  %v186_v0 = vmul.f32 0.6931472, %v235_v61 }
 0x2a7   :  { %v188_v2 = vadd.f32 %v186_v0, %v180_v1  ;;  %193 = vst.msk [vmem:[%s307_s4] sm:$0xff] %vm22_vm2, %v191_v63 }
 0x2a9   :  { %v192_v4 = vsub.f32 %v188_v2, %v190_v3 }
 0x2ab   :  { %194 = vst.msk [vmem:[%s307_s4 + $0x8] sm:$0xff] %vm22_vm2, %v192_v4 }

</bundles_post_ra>
